<compile_context>
chip_gen: v6e
topology: v6e:2x2x1
jax: 0.10.0
libtpu: 0.0.40
codegen_flags: <defaults>
</compile_context>

<pallas_src>
import jax
import jax.numpy as jnp
from jax.experimental import pallas as pl
from jax.experimental.pallas import tpu as pltpu


# ---------------------------------------------------------------------------
# Fused kernel: per-timestep GCN + LSTM cell (unrolled over W) + final FFN.
#   shots_ref : (W, B, N, N)      time-major adjacency (A, without self loops)
#   nodes_ref : (W, B, N, Fin)    time-major random node features
#   gcn_w_ref : (W, Fin, Fout)
#   w_ih_ref  : (D, 4H)   D = N*Fout          w_hh_ref : (H, 4H)
#   b_ref     : (1, 4H)   (b_ih + b_hh)
#   w_ffn_ref : (H, N*N)          b_ffn_ref : (1, N*N)
#   out_ref   : (B, N*N)
#   ybuf      : (B, N, Fout) VMEM scratch     xbuf : (B, D) VMEM scratch
# ---------------------------------------------------------------------------
def generator_kernel(shots_ref, nodes_ref, gcn_w_ref, w_ih_ref, w_hh_ref,
                     b_ref, w_ffn_ref, b_ffn_ref, out_ref, ybuf, xbuf):
    W = shots_ref.shape[0]
    B = shots_ref.shape[1]
    N = shots_ref.shape[2]
    Fin = nodes_ref.shape[3]
    Fout = gcn_w_ref.shape[2]
    H = w_hh_ref.shape[0]

    h = jnp.zeros((B, H), jnp.float32)
    c = jnp.zeros((B, H), jnp.float32)

    for t in range(W):                       # W is tiny (4): full unroll
        # ---------------- GCN for timestep t, all batches at once ----------
        a = shots_ref[t]                     # (B, N, N)
        x = nodes_ref[t]                     # (B, N, Fin)
        # d = rowsum(A + I)^{-1/2}; identity avoids building eye explicitly
        d = jax.lax.rsqrt(jnp.sum(a, axis=-1, keepdims=True) + 1.0)   # (B,N,1)
        xs = d * x                                                     # D^{-1/2} X
        msg = d * (jnp.einsum('bij,bjf->bif', a, xs,
                              preferred_element_type=jnp.float32) + xs)
        # (B,N,Fin) -> (B,N,Fout) with the per-window weight (shared over b)
        w_t = jnp.broadcast_to(gcn_w_ref[t], (B, Fin, Fout))
        y = jnp.einsum('bnk,bkf->bnf', msg, w_t,
                       preferred_element_type=jnp.float32)             # (B,N,Fout)

        # Flatten (B, N, Fout) -> (B, N*Fout) lane-dense via VMEM scratch
        # (explicit relayout through memory; avoids a lane-folding reshape).
        ybuf[...] = y
        for n in range(N):
            xbuf[:, n * Fout:(n + 1) * Fout] = ybuf[:, n, :]
        x_t = xbuf[...]                      # (B, D)

        # ---------------- LSTM cell (PyTorch gate order i, f, g, o) --------
        gates = (jnp.dot(x_t, w_ih_ref[...], preferred_element_type=jnp.float32)
                 + jnp.dot(h, w_hh_ref[...], preferred_element_type=jnp.float32)
                 + b_ref[...])               # (B, 4H)
        i_g = jax.nn.sigmoid(gates[:, 0 * H:1 * H])
        f_g = jax.nn.sigmoid(gates[:, 1 * H:2 * H])
        g_g = jnp.tanh(gates[:, 2 * H:3 * H])
        o_g = jax.nn.sigmoid(gates[:, 3 * H:4 * H])
        c = f_g * c + i_g * g_g
        h = o_g * jnp.tanh(c)

    # ---------------- FFN + sigmoid on the final hidden state --------------
    logits = jnp.dot(h, w_ffn_ref[...], preferred_element_type=jnp.float32) \
        + b_ffn_ref[...]
    out_ref[...] = jax.nn.sigmoid(logits)


# ---------------------------------------------------------------------------
# Wrapper
# ---------------------------------------------------------------------------
def generator_forward(in_shots, nodes, params):
    B, W, N, _ = in_shots.shape
    gcn_w = params["gcn_w"]                        # (W, Fin, Fout)
    Fout = gcn_w.shape[2]
    H = params["w_hh"].shape[1]
    D = N * Fout
    NN = N * N

    # Time-major inputs so the kernel only needs leading-axis ref indexing.
    shots_tm = jnp.transpose(in_shots, (1, 0, 2, 3))     # (W, B, N, N)
    nodes_tm = jnp.transpose(nodes, (1, 0, 2, 3))        # (W, B, N, Fin)
    w_ih_t = params["w_ih"].T                            # (D, 4H)
    w_hh_t = params["w_hh"].T                            # (H, 4H)
    b_lstm = (params["b_ih"] + params["b_hh"]).reshape(1, 4 * H)
    w_ffn_t = params["w_ffn"].T                          # (H, N*N)
    b_ffn = params["b_ffn"].reshape(1, NN)

    out = pl.pallas_call(
        generator_kernel,
        out_shape=jax.ShapeDtypeStruct((B, NN), jnp.float32),
        scratch_shapes=[pltpu.VMEM((B, N, Fout), jnp.float32),
                        pltpu.VMEM((B, D), jnp.float32)],
    )(shots_tm, nodes_tm, gcn_w, w_ih_t, w_hh_t, b_lstm, w_ffn_t, b_ffn)

    # PyTorch applies ffn to hn of shape (num_layers=1, B, H) -> (1, B, N*N)
    return out.reshape(1, B, NN)


# ---------------------------------------------------------------------------
# Pure-JAX reference mirroring the PyTorch forward (for correctness check)
# ---------------------------------------------------------------------------
def generator_reference(in_shots, nodes, params):
    B, W, N, _ = in_shots.shape
    H = params["w_hh"].shape[1]
    eye = jnp.eye(N, dtype=in_shots.dtype)
    a = in_shots + eye
    d = jnp.sum(a, axis=-1, keepdims=True) ** -0.5
    diag = d * eye
    adj = diag @ a @ diag
    gcn = adj @ nodes @ params["gcn_w"][None]            # (B, W, N, Fout)
    x = gcn.reshape(B, W, -1)
    h = jnp.zeros((B, H), jnp.float32)
    c = jnp.zeros((B, H), jnp.float32)
    for t in range(W):
        g = x[:, t] @ params["w_ih"].T + h @ params["w_hh"].T \
            + params["b_ih"] + params["b_hh"]
        i_g = jax.nn.sigmoid(g[:, 0 * H:1 * H])
        f_g = jax.nn.sigmoid(g[:, 1 * H:2 * H])
        g_g = jnp.tanh(g[:, 2 * H:3 * H])
        o_g = jax.nn.sigmoid(g[:, 3 * H:4 * H])
        c = f_g * c + i_g * g_g
        h = o_g * jnp.tanh(c)
    out = jax.nn.sigmoid(h @ params["w_ffn"].T + params["b_ffn"])
    return out.reshape(1, B, N * N)


# ---------------------------------------------------------------------------
# Deterministic synthetic parameter init (shapes from the PyTorch __init__)
# ---------------------------------------------------------------------------
def init_params(key, window_size, node_num, in_features, out_features, lstm_features):
    D = out_features * node_num
    H = lstm_features
    NN = node_num * node_num
    k1, k2, k3, k4, k5, k6, k7 = jax.random.split(key, 7)
    xav = (6.0 / (in_features + out_features)) ** 0.5
    gcn_w = jax.random.uniform(k1, (window_size, in_features, out_features),
                               jnp.float32, -xav, xav)
    k = 1.0 / (H ** 0.5)
    w_ih = jax.random.uniform(k2, (4 * H, D), jnp.float32, -k, k)
    w_hh = jax.random.uniform(k3, (4 * H, H), jnp.float32, -k, k)
    b_ih = jax.random.uniform(k4, (4 * H,), jnp.float32, -k, k)
    b_hh = jax.random.uniform(k5, (4 * H,), jnp.float32, -k, k)
    w_ffn = jax.random.uniform(k6, (NN, H), jnp.float32, -k, k)
    b_ffn = jax.random.uniform(k7, (NN,), jnp.float32, -k, k)
    return dict(gcn_w=gcn_w, w_ih=w_ih, w_hh=w_hh, b_ih=b_ih, b_hh=b_hh,
                w_ffn=w_ffn, b_ffn=b_ffn)


if __name__ == "__main__":
    B, W, N = 2, 4, 8          # batch, window_size, node_num
    Fin, Fout, H = 8, 16, 32   # in_features, out_features, lstm_features

    key = jax.random.PRNGKey(0)
    kp, kx, kn = jax.random.split(key, 3)
    params = init_params(kp, W, N, Fin, Fout, H)
    in_shots = jax.random.uniform(kx, (B, W, N, N), jnp.float32)
    # TODO(synk): torch.rand inside forward() cannot be bit-matched; the random
    # node features are generated deterministically here with jax.random instead.
    nodes = jax.random.uniform(kn, (B, W, N, Fin), jnp.float32)

    fwd = jax.jit(generator_forward)
    out = jax.block_until_ready(fwd(in_shots, nodes, params))

    assert out.shape == (1, B, N * N), out.shape
    assert out.dtype == jnp.float32
    assert bool(jnp.all(jnp.isfinite(out)))
    assert bool(jnp.all((out >= 0.0) & (out <= 1.0)))  # sigmoid range

    ref = generator_reference(in_shots, nodes, params)
    assert bool(jnp.allclose(out, ref, atol=5e-3, rtol=5e-3)), \
        float(jnp.max(jnp.abs(out - ref)))

    print("KERNEL_OK")
</pallas_src>

<mosaic_0001>
module attributes {stable_mosaic.version = 11 : i64} {
  func.func @generator_kernel(%arg0: memref<4x2x8x8xf32, #tpu.memory_space<vmem>>, %arg1: memref<4x2x8x8xf32, #tpu.memory_space<vmem>>, %arg2: memref<4x8x16xf32, #tpu.memory_space<vmem>>, %arg3: memref<128x128xf32, #tpu.memory_space<vmem>>, %arg4: memref<32x128xf32, #tpu.memory_space<vmem>>, %arg5: memref<1x128xf32, #tpu.memory_space<vmem>>, %arg6: memref<32x64xf32, #tpu.memory_space<vmem>>, %arg7: memref<1x64xf32, #tpu.memory_space<vmem>>, %arg8: memref<2x64xf32, #tpu.memory_space<vmem>>, %arg9: memref<2x8x16xf32, #tpu.memory_space<vmem>>, %arg10: memref<2x128xf32, #tpu.memory_space<vmem>>) attributes {dimension_semantics = [], scalar_prefetch = 0 : i64, scratch_operands = 2 : i64, tpu.core_type = #tpu.core_type<tc>} {
    %cst = arith.constant 0.000000e+00 : f32
    %0 = vector.broadcast %cst : f32 to vector<2x32xf32>
    %cst_0 = arith.constant 0.000000e+00 : f32
    %1 = vector.broadcast %cst_0 : f32 to vector<2x32xf32>
    %c0 = arith.constant 0 : index
    %c0_1 = arith.constant 0 : index
    %c0_2 = arith.constant 0 : index
    %c0_3 = arith.constant 0 : index
    %2 = vector.load %arg0[%c0, %c0_1, %c0_2, %c0_3] : memref<4x2x8x8xf32, #tpu.memory_space<vmem>>, vector<1x2x8x8xf32>
    %3 = vector.shape_cast %2 : vector<1x2x8x8xf32> to vector<2x8x8xf32>
    %c0_4 = arith.constant 0 : index
    %c0_5 = arith.constant 0 : index
    %c0_6 = arith.constant 0 : index
    %c0_7 = arith.constant 0 : index
    %4 = vector.load %arg1[%c0_4, %c0_5, %c0_6, %c0_7] : memref<4x2x8x8xf32, #tpu.memory_space<vmem>>, vector<1x2x8x8xf32>
    %5 = vector.shape_cast %4 : vector<1x2x8x8xf32> to vector<2x8x8xf32>
    %cst_8 = arith.constant dense<0.000000e+00> : vector<2x8xf32>
    %6 = vector.multi_reduction <add>, %3, %cst_8 [2] : vector<2x8x8xf32> to vector<2x8xf32>
    %7 = vector.shape_cast %6 : vector<2x8xf32> to vector<2x8x1xf32>
    %cst_9 = arith.constant 1.000000e+00 : f32
    %8 = vector.broadcast %cst_9 : f32 to vector<2x8x1xf32>
    %9 = arith.addf %7, %8 : vector<2x8x1xf32>
    %10 = math.rsqrt %9 : vector<2x8x1xf32>
    %11 = vector.broadcast %10 : vector<2x8x1xf32> to vector<2x8x8xf32>
    %12 = arith.mulf %11, %5 : vector<2x8x8xf32>
    "tpu.trace_start"() <{level = 10 : i32, message = "bij,bjf->bif"}> : () -> ()
    %cst_10 = arith.constant dense<0.000000e+00> : vector<2x8x8xf32>
    %13 = tpu.matmul %3, %12, %cst_10 {dimension_numbers = #tpu.dot_dimension_numbers<[2], [1], [1], [2], [0, 0, 0, 1, 1, 2], [0], [0]>} : vector<2x8x8xf32>, vector<2x8x8xf32>, vector<2x8x8xf32> -> vector<2x8x8xf32>
    "tpu.trace_stop"() : () -> ()
    %14 = arith.addf %13, %12 : vector<2x8x8xf32>
    %15 = vector.broadcast %10 : vector<2x8x1xf32> to vector<2x8x8xf32>
    %16 = arith.mulf %15, %14 : vector<2x8x8xf32>
    %c0_11 = arith.constant 0 : index
    %c0_12 = arith.constant 0 : index
    %c0_13 = arith.constant 0 : index
    %17 = vector.load %arg2[%c0_11, %c0_12, %c0_13] : memref<4x8x16xf32, #tpu.memory_space<vmem>>, vector<1x8x16xf32>
    %18 = vector.shape_cast %17 : vector<1x8x16xf32> to vector<8x16xf32>
    %19 = vector.shape_cast %18 : vector<8x16xf32> to vector<1x8x16xf32>
    %20 = vector.broadcast %19 : vector<1x8x16xf32> to vector<2x8x16xf32>
    "tpu.trace_start"() <{level = 10 : i32, message = "bnk,bkf->bnf"}> : () -> ()
    %cst_14 = arith.constant dense<0.000000e+00> : vector<2x8x16xf32>
    %21 = tpu.matmul %16, %20, %cst_14 {dimension_numbers = #tpu.dot_dimension_numbers<[2], [1], [1], [2], [0, 0, 0, 1, 1, 2], [0], [0]>} : vector<2x8x8xf32>, vector<2x8x16xf32>, vector<2x8x16xf32> -> vector<2x8x16xf32>
    "tpu.trace_stop"() : () -> ()
    %c0_15 = arith.constant 0 : index
    %c0_16 = arith.constant 0 : index
    %c0_17 = arith.constant 0 : index
    %22 = vector.load %arg9[%c0_15, %c0_16, %c0_17] : memref<2x8x16xf32, #tpu.memory_space<vmem>>, vector<2x8x16xf32>
    tpu.vector_store %arg9[%c0_15, %c0_16, %c0_17], %21 {strides = array<i32>} : memref<2x8x16xf32, #tpu.memory_space<vmem>>, vector<2x8x16xf32>,
    %c0_18 = arith.constant 0 : index
    %c0_19 = arith.constant 0 : index
    %c0_20 = arith.constant 0 : index
    %23 = vector.load %arg9[%c0_18, %c0_19, %c0_20] : memref<2x8x16xf32, #tpu.memory_space<vmem>>, vector<2x1x16xf32>
    %24 = vector.shape_cast %23 : vector<2x1x16xf32> to vector<2x16xf32>
    %c0_21 = arith.constant 0 : index
    %c0_22 = arith.constant 0 : index
    %25 = vector.load %arg10[%c0_21, %c0_22] : memref<2x128xf32, #tpu.memory_space<vmem>>, vector<2x16xf32>
    tpu.vector_store %arg10[%c0_21, %c0_22], %24 {strides = array<i32>} : memref<2x128xf32, #tpu.memory_space<vmem>>, vector<2x16xf32>,
    %c0_23 = arith.constant 0 : index
    %c1 = arith.constant 1 : index
    %c0_24 = arith.constant 0 : index
    %26 = vector.load %arg9[%c0_23, %c1, %c0_24] : memref<2x8x16xf32, #tpu.memory_space<vmem>>, vector<2x1x16xf32>
    %27 = vector.shape_cast %26 : vector<2x1x16xf32> to vector<2x16xf32>
    %c0_25 = arith.constant 0 : index
    %c16 = arith.constant 16 : index
    %28 = vector.load %arg10[%c0_25, %c16] : memref<2x128xf32, #tpu.memory_space<vmem>>, vector<2x16xf32>
    tpu.vector_store %arg10[%c0_25, %c16], %27 {strides = array<i32>} : memref<2x128xf32, #tpu.memory_space<vmem>>, vector<2x16xf32>,
    %c0_26 = arith.constant 0 : index
    %c2 = arith.constant 2 : index
    %c0_27 = arith.constant 0 : index
    %29 = vector.load %arg9[%c0_26, %c2, %c0_27] : memref<2x8x16xf32, #tpu.memory_space<vmem>>, vector<2x1x16xf32>
    %30 = vector.shape_cast %29 : vector<2x1x16xf32> to vector<2x16xf32>
    %c0_28 = arith.constant 0 : index
    %c32 = arith.constant 32 : index
    %31 = vector.load %arg10[%c0_28, %c32] : memref<2x128xf32, #tpu.memory_space<vmem>>, vector<2x16xf32>
    tpu.vector_store %arg10[%c0_28, %c32], %30 {strides = array<i32>} : memref<2x128xf32, #tpu.memory_space<vmem>>, vector<2x16xf32>,
    %c0_29 = arith.constant 0 : index
    %c3 = arith.constant 3 : index
    %c0_30 = arith.constant 0 : index
    %32 = vector.load %arg9[%c0_29, %c3, %c0_30] : memref<2x8x16xf32, #tpu.memory_space<vmem>>, vector<2x1x16xf32>
    %33 = vector.shape_cast %32 : vector<2x1x16xf32> to vector<2x16xf32>
    %c0_31 = arith.constant 0 : index
    %c48 = arith.constant 48 : index
    %34 = vector.load %arg10[%c0_31, %c48] : memref<2x128xf32, #tpu.memory_space<vmem>>, vector<2x16xf32>
    tpu.vector_store %arg10[%c0_31, %c48], %33 {strides = array<i32>} : memref<2x128xf32, #tpu.memory_space<vmem>>, vector<2x16xf32>,
    %c0_32 = arith.constant 0 : index
    %c4 = arith.constant 4 : index
    %c0_33 = arith.constant 0 : index
    %35 = vector.load %arg9[%c0_32, %c4, %c0_33] : memref<2x8x16xf32, #tpu.memory_space<vmem>>, vector<2x1x16xf32>
    %36 = vector.shape_cast %35 : vector<2x1x16xf32> to vector<2x16xf32>
    %c0_34 = arith.constant 0 : index
    %c64 = arith.constant 64 : index
    %37 = vector.load %arg10[%c0_34, %c64] : memref<2x128xf32, #tpu.memory_space<vmem>>, vector<2x16xf32>
    tpu.vector_store %arg10[%c0_34, %c64], %36 {strides = array<i32>} : memref<2x128xf32, #tpu.memory_space<vmem>>, vector<2x16xf32>,
    %c0_35 = arith.constant 0 : index
    %c5 = arith.constant 5 : index
    %c0_36 = arith.constant 0 : index
    %38 = vector.load %arg9[%c0_35, %c5, %c0_36] : memref<2x8x16xf32, #tpu.memory_space<vmem>>, vector<2x1x16xf32>
    %39 = vector.shape_cast %38 : vector<2x1x16xf32> to vector<2x16xf32>
    %c0_37 = arith.constant 0 : index
    %c80 = arith.constant 80 : index
    %40 = vector.load %arg10[%c0_37, %c80] : memref<2x128xf32, #tpu.memory_space<vmem>>, vector<2x16xf32>
    tpu.vector_store %arg10[%c0_37, %c80], %39 {strides = array<i32>} : memref<2x128xf32, #tpu.memory_space<vmem>>, vector<2x16xf32>,
    %c0_38 = arith.constant 0 : index
    %c6 = arith.constant 6 : index
    %c0_39 = arith.constant 0 : index
    %41 = vector.load %arg9[%c0_38, %c6, %c0_39] : memref<2x8x16xf32, #tpu.memory_space<vmem>>, vector<2x1x16xf32>
    %42 = vector.shape_cast %41 : vector<2x1x16xf32> to vector<2x16xf32>
    %c0_40 = arith.constant 0 : index
    %c96 = arith.constant 96 : index
    %43 = vector.load %arg10[%c0_40, %c96] : memref<2x128xf32, #tpu.memory_space<vmem>>, vector<2x16xf32>
    tpu.vector_store %arg10[%c0_40, %c96], %42 {strides = array<i32>} : memref<2x128xf32, #tpu.memory_space<vmem>>, vector<2x16xf32>,
    %c0_41 = arith.constant 0 : index
    %c7 = arith.constant 7 : index
    %c0_42 = arith.constant 0 : index
    %44 = vector.load %arg9[%c0_41, %c7, %c0_42] : memref<2x8x16xf32, #tpu.memory_space<vmem>>, vector<2x1x16xf32>
    %45 = vector.shape_cast %44 : vector<2x1x16xf32> to vector<2x16xf32>
    %c0_43 = arith.constant 0 : index
    %c112 = arith.constant 112 : index
    %46 = vector.load %arg10[%c0_43, %c112] : memref<2x128xf32, #tpu.memory_space<vmem>>, vector<2x16xf32>
    tpu.vector_store %arg10[%c0_43, %c112], %45 {strides = array<i32>} : memref<2x128xf32, #tpu.memory_space<vmem>>, vector<2x16xf32>,
    %c0_44 = arith.constant 0 : index
    %c0_45 = arith.constant 0 : index
    %47 = vector.load %arg10[%c0_44, %c0_45] : memref<2x128xf32, #tpu.memory_space<vmem>>, vector<2x128xf32>
    %c0_46 = arith.constant 0 : index
    %c0_47 = arith.constant 0 : index
    %48 = vector.load %arg3[%c0_46, %c0_47] : memref<128x128xf32, #tpu.memory_space<vmem>>, vector<128x128xf32>
    %cst_48 = arith.constant dense<0.000000e+00> : vector<2x128xf32>
    %49 = tpu.matmul %47, %48, %cst_48 {dimension_numbers = #tpu.dot_dimension_numbers<[1], [0], [0], [1], [0, 0, 1, 1], [], []>} : vector<2x128xf32>, vector<128x128xf32>, vector<2x128xf32> -> vector<2x128xf32>
    %c0_49 = arith.constant 0 : index
    %c0_50 = arith.constant 0 : index
    %50 = vector.load %arg4[%c0_49, %c0_50] : memref<32x128xf32, #tpu.memory_space<vmem>>, vector<32x128xf32>
    %cst_51 = arith.constant dense<0.000000e+00> : vector<2x128xf32>
    %51 = tpu.matmul %0, %50, %cst_51 {dimension_numbers = #tpu.dot_dimension_numbers<[1], [0], [0], [1], [0, 0, 1, 1], [], []>} : vector<2x32xf32>, vector<32x128xf32>, vector<2x128xf32> -> vector<2x128xf32>
    %52 = arith.addf %49, %51 : vector<2x128xf32>
    %c0_52 = arith.constant 0 : index
    %c0_53 = arith.constant 0 : index
    %53 = vector.load %arg5[%c0_52, %c0_53] : memref<1x128xf32, #tpu.memory_space<vmem>>, vector<1x128xf32>
    %54 = vector.broadcast %53 : vector<1x128xf32> to vector<2x128xf32>
    %55 = arith.addf %52, %54 : vector<2x128xf32>
    %56 = vector.extract_strided_slice %55 {offsets = [0, 0], sizes = [2, 32], strides = [1, 1]} : vector<2x128xf32> to vector<2x32xf32>
    %57 = arith.negf %56 : vector<2x32xf32>
    %58 = math.exp %57 : vector<2x32xf32>
    %cst_54 = arith.constant 1.000000e+00 : f32
    %59 = vector.broadcast %cst_54 : f32 to vector<2x32xf32>
    %60 = arith.addf %59, %58 : vector<2x32xf32>
    %61 = arith.divf %59, %60 : vector<2x32xf32>
    %62 = vector.extract_strided_slice %55 {offsets = [0, 32], sizes = [2, 32], strides = [1, 1]} : vector<2x128xf32> to vector<2x32xf32>
    %63 = arith.negf %62 : vector<2x32xf32>
    %64 = math.exp %63 : vector<2x32xf32>
    %cst_55 = arith.constant 1.000000e+00 : f32
    %65 = vector.broadcast %cst_55 : f32 to vector<2x32xf32>
    %66 = arith.addf %65, %64 : vector<2x32xf32>
    %67 = arith.divf %65, %66 : vector<2x32xf32>
    %68 = vector.extract_strided_slice %55 {offsets = [0, 64], sizes = [2, 32], strides = [1, 1]} : vector<2x128xf32> to vector<2x32xf32>
    %69 = math.tanh %68 : vector<2x32xf32>
    %70 = vector.extract_strided_slice %55 {offsets = [0, 96], sizes = [2, 32], strides = [1, 1]} : vector<2x128xf32> to vector<2x32xf32>
    %71 = arith.negf %70 : vector<2x32xf32>
    %72 = math.exp %71 : vector<2x32xf32>
    %cst_56 = arith.constant 1.000000e+00 : f32
    %73 = vector.broadcast %cst_56 : f32 to vector<2x32xf32>
    %74 = arith.addf %73, %72 : vector<2x32xf32>
    %75 = arith.divf %73, %74 : vector<2x32xf32>
    %76 = arith.mulf %67, %1 : vector<2x32xf32>
    %77 = arith.mulf %61, %69 : vector<2x32xf32>
    %78 = arith.addf %76, %77 : vector<2x32xf32>
    %79 = math.tanh %78 : vector<2x32xf32>
    %80 = arith.mulf %75, %79 : vector<2x32xf32>
    %c1_57 = arith.constant 1 : index
    %c0_58 = arith.constant 0 : index
    %c0_59 = arith.constant 0 : index
    %c0_60 = arith.constant 0 : index
    %81 = vector.load %arg0[%c1_57, %c0_58, %c0_59, %c0_60] : memref<4x2x8x8xf32, #tpu.memory_space<vmem>>, vector<1x2x8x8xf32>
    %82 = vector.shape_cast %81 : vector<1x2x8x8xf32> to vector<2x8x8xf32>
    %c1_61 = arith.constant 1 : index
    %c0_62 = arith.constant 0 : index
    %c0_63 = arith.constant 0 : index
    %c0_64 = arith.constant 0 : index
    %83 = vector.load %arg1[%c1_61, %c0_62, %c0_63, %c0_64] : memref<4x2x8x8xf32, #tpu.memory_space<vmem>>, vector<1x2x8x8xf32>
    %84 = vector.shape_cast %83 : vector<1x2x8x8xf32> to vector<2x8x8xf32>
    %cst_65 = arith.constant dense<0.000000e+00> : vector<2x8xf32>
    %85 = vector.multi_reduction <add>, %82, %cst_65 [2] : vector<2x8x8xf32> to vector<2x8xf32>
    %86 = vector.shape_cast %85 : vector<2x8xf32> to vector<2x8x1xf32>
    %cst_66 = arith.constant 1.000000e+00 : f32
    %87 = vector.broadcast %cst_66 : f32 to vector<2x8x1xf32>
    %88 = arith.addf %86, %87 : vector<2x8x1xf32>
    %89 = math.rsqrt %88 : vector<2x8x1xf32>
    %90 = vector.broadcast %89 : vector<2x8x1xf32> to vector<2x8x8xf32>
    %91 = arith.mulf %90, %84 : vector<2x8x8xf32>
    "tpu.trace_start"() <{level = 10 : i32, message = "bij,bjf->bif"}> : () -> ()
    %cst_67 = arith.constant dense<0.000000e+00> : vector<2x8x8xf32>
    %92 = tpu.matmul %82, %91, %cst_67 {dimension_numbers = #tpu.dot_dimension_numbers<[2], [1], [1], [2], [0, 0, 0, 1, 1, 2], [0], [0]>} : vector<2x8x8xf32>, vector<2x8x8xf32>, vector<2x8x8xf32> -> vector<2x8x8xf32>
    "tpu.trace_stop"() : () -> ()
    %93 = arith.addf %92, %91 : vector<2x8x8xf32>
    %94 = vector.broadcast %89 : vector<2x8x1xf32> to vector<2x8x8xf32>
    %95 = arith.mulf %94, %93 : vector<2x8x8xf32>
    %c1_68 = arith.constant 1 : index
    %c0_69 = arith.constant 0 : index
    %c0_70 = arith.constant 0 : index
    %96 = vector.load %arg2[%c1_68, %c0_69, %c0_70] : memref<4x8x16xf32, #tpu.memory_space<vmem>>, vector<1x8x16xf32>
    %97 = vector.shape_cast %96 : vector<1x8x16xf32> to vector<8x16xf32>
    %98 = vector.shape_cast %97 : vector<8x16xf32> to vector<1x8x16xf32>
    %99 = vector.broadcast %98 : vector<1x8x16xf32> to vector<2x8x16xf32>
    "tpu.trace_start"() <{level = 10 : i32, message = "bnk,bkf->bnf"}> : () -> ()
    %cst_71 = arith.constant dense<0.000000e+00> : vector<2x8x16xf32>
    %100 = tpu.matmul %95, %99, %cst_71 {dimension_numbers = #tpu.dot_dimension_numbers<[2], [1], [1], [2], [0, 0, 0, 1, 1, 2], [0], [0]>} : vector<2x8x8xf32>, vector<2x8x16xf32>, vector<2x8x16xf32> -> vector<2x8x16xf32>
    "tpu.trace_stop"() : () -> ()
    %c0_72 = arith.constant 0 : index
    %c0_73 = arith.constant 0 : index
    %c0_74 = arith.constant 0 : index
    %101 = vector.load %arg9[%c0_72, %c0_73, %c0_74] : memref<2x8x16xf32, #tpu.memory_space<vmem>>, vector<2x8x16xf32>
    tpu.vector_store %arg9[%c0_72, %c0_73, %c0_74], %100 {strides = array<i32>} : memref<2x8x16xf32, #tpu.memory_space<vmem>>, vector<2x8x16xf32>,
    %c0_75 = arith.constant 0 : index
    %c0_76 = arith.constant 0 : index
    %c0_77 = arith.constant 0 : index
    %102 = vector.load %arg9[%c0_75, %c0_76, %c0_77] : memref<2x8x16xf32, #tpu.memory_space<vmem>>, vector<2x1x16xf32>
    %103 = vector.shape_cast %102 : vector<2x1x16xf32> to vector<2x16xf32>
    %c0_78 = arith.constant 0 : index
    %c0_79 = arith.constant 0 : index
    %104 = vector.load %arg10[%c0_78, %c0_79] : memref<2x128xf32, #tpu.memory_space<vmem>>, vector<2x16xf32>
    tpu.vector_store %arg10[%c0_78, %c0_79], %103 {strides = array<i32>} : memref<2x128xf32, #tpu.memory_space<vmem>>, vector<2x16xf32>,
    %c0_80 = arith.constant 0 : index
    %c1_81 = arith.constant 1 : index
    %c0_82 = arith.constant 0 : index
    %105 = vector.load %arg9[%c0_80, %c1_81, %c0_82] : memref<2x8x16xf32, #tpu.memory_space<vmem>>, vector<2x1x16xf32>
    %106 = vector.shape_cast %105 : vector<2x1x16xf32> to vector<2x16xf32>
    %c0_83 = arith.constant 0 : index
    %c16_84 = arith.constant 16 : index
    %107 = vector.load %arg10[%c0_83, %c16_84] : memref<2x128xf32, #tpu.memory_space<vmem>>, vector<2x16xf32>
    tpu.vector_store %arg10[%c0_83, %c16_84], %106 {strides = array<i32>} : memref<2x128xf32, #tpu.memory_space<vmem>>, vector<2x16xf32>,
    %c0_85 = arith.constant 0 : index
    %c2_86 = arith.constant 2 : index
    %c0_87 = arith.constant 0 : index
    %108 = vector.load %arg9[%c0_85, %c2_86, %c0_87] : memref<2x8x16xf32, #tpu.memory_space<vmem>>, vector<2x1x16xf32>
    %109 = vector.shape_cast %108 : vector<2x1x16xf32> to vector<2x16xf32>
    %c0_88 = arith.constant 0 : index
    %c32_89 = arith.constant 32 : index
    %110 = vector.load %arg10[%c0_88, %c32_89] : memref<2x128xf32, #tpu.memory_space<vmem>>, vector<2x16xf32>
    tpu.vector_store %arg10[%c0_88, %c32_89], %109 {strides = array<i32>} : memref<2x128xf32, #tpu.memory_space<vmem>>, vector<2x16xf32>,
    %c0_90 = arith.constant 0 : index
    %c3_91 = arith.constant 3 : index
    %c0_92 = arith.constant 0 : index
    %111 = vector.load %arg9[%c0_90, %c3_91, %c0_92] : memref<2x8x16xf32, #tpu.memory_space<vmem>>, vector<2x1x16xf32>
    %112 = vector.shape_cast %111 : vector<2x1x16xf32> to vector<2x16xf32>
    %c0_93 = arith.constant 0 : index
    %c48_94 = arith.constant 48 : index
    %113 = vector.load %arg10[%c0_93, %c48_94] : memref<2x128xf32, #tpu.memory_space<vmem>>, vector<2x16xf32>
    tpu.vector_store %arg10[%c0_93, %c48_94], %112 {strides = array<i32>} : memref<2x128xf32, #tpu.memory_space<vmem>>, vector<2x16xf32>,
    %c0_95 = arith.constant 0 : index
    %c4_96 = arith.constant 4 : index
    %c0_97 = arith.constant 0 : index
    %114 = vector.load %arg9[%c0_95, %c4_96, %c0_97] : memref<2x8x16xf32, #tpu.memory_space<vmem>>, vector<2x1x16xf32>
    %115 = vector.shape_cast %114 : vector<2x1x16xf32> to vector<2x16xf32>
    %c0_98 = arith.constant 0 : index
    %c64_99 = arith.constant 64 : index
    %116 = vector.load %arg10[%c0_98, %c64_99] : memref<2x128xf32, #tpu.memory_space<vmem>>, vector<2x16xf32>
    tpu.vector_store %arg10[%c0_98, %c64_99], %115 {strides = array<i32>} : memref<2x128xf32, #tpu.memory_space<vmem>>, vector<2x16xf32>,
    %c0_100 = arith.constant 0 : index
    %c5_101 = arith.constant 5 : index
    %c0_102 = arith.constant 0 : index
    %117 = vector.load %arg9[%c0_100, %c5_101, %c0_102] : memref<2x8x16xf32, #tpu.memory_space<vmem>>, vector<2x1x16xf32>
    %118 = vector.shape_cast %117 : vector<2x1x16xf32> to vector<2x16xf32>
    %c0_103 = arith.constant 0 : index
    %c80_104 = arith.constant 80 : index
    %119 = vector.load %arg10[%c0_103, %c80_104] : memref<2x128xf32, #tpu.memory_space<vmem>>, vector<2x16xf32>
    tpu.vector_store %arg10[%c0_103, %c80_104], %118 {strides = array<i32>} : memref<2x128xf32, #tpu.memory_space<vmem>>, vector<2x16xf32>,
    %c0_105 = arith.constant 0 : index
    %c6_106 = arith.constant 6 : index
    %c0_107 = arith.constant 0 : index
    %120 = vector.load %arg9[%c0_105, %c6_106, %c0_107] : memref<2x8x16xf32, #tpu.memory_space<vmem>>, vector<2x1x16xf32>
    %121 = vector.shape_cast %120 : vector<2x1x16xf32> to vector<2x16xf32>
    %c0_108 = arith.constant 0 : index
    %c96_109 = arith.constant 96 : index
    %122 = vector.load %arg10[%c0_108, %c96_109] : memref<2x128xf32, #tpu.memory_space<vmem>>, vector<2x16xf32>
    tpu.vector_store %arg10[%c0_108, %c96_109], %121 {strides = array<i32>} : memref<2x128xf32, #tpu.memory_space<vmem>>, vector<2x16xf32>,
    %c0_110 = arith.constant 0 : index
    %c7_111 = arith.constant 7 : index
    %c0_112 = arith.constant 0 : index
    %123 = vector.load %arg9[%c0_110, %c7_111, %c0_112] : memref<2x8x16xf32, #tpu.memory_space<vmem>>, vector<2x1x16xf32>
    %124 = vector.shape_cast %123 : vector<2x1x16xf32> to vector<2x16xf32>
    %c0_113 = arith.constant 0 : index
    %c112_114 = arith.constant 112 : index
    %125 = vector.load %arg10[%c0_113, %c112_114] : memref<2x128xf32, #tpu.memory_space<vmem>>, vector<2x16xf32>
    tpu.vector_store %arg10[%c0_113, %c112_114], %124 {strides = array<i32>} : memref<2x128xf32, #tpu.memory_space<vmem>>, vector<2x16xf32>,
    %c0_115 = arith.constant 0 : index
    %c0_116 = arith.constant 0 : index
    %126 = vector.load %arg10[%c0_115, %c0_116] : memref<2x128xf32, #tpu.memory_space<vmem>>, vector<2x128xf32>
    %c0_117 = arith.constant 0 : index
    %c0_118 = arith.constant 0 : index
    %127 = vector.load %arg3[%c0_117, %c0_118] : memref<128x128xf32, #tpu.memory_space<vmem>>, vector<128x128xf32>
    %cst_119 = arith.constant dense<0.000000e+00> : vector<2x128xf32>
    %128 = tpu.matmul %126, %127, %cst_119 {dimension_numbers = #tpu.dot_dimension_numbers<[1], [0], [0], [1], [0, 0, 1, 1], [], []>} : vector<2x128xf32>, vector<128x128xf32>, vector<2x128xf32> -> vector<2x128xf32>
    %c0_120 = arith.constant 0 : index
    %c0_121 = arith.constant 0 : index
    %129 = vector.load %arg4[%c0_120, %c0_121] : memref<32x128xf32, #tpu.memory_space<vmem>>, vector<32x128xf32>
    %cst_122 = arith.constant dense<0.000000e+00> : vector<2x128xf32>
    %130 = tpu.matmul %80, %129, %cst_122 {dimension_numbers = #tpu.dot_dimension_numbers<[1], [0], [0], [1], [0, 0, 1, 1], [], []>} : vector<2x32xf32>, vector<32x128xf32>, vector<2x128xf32> -> vector<2x128xf32>
    %131 = arith.addf %128, %130 : vector<2x128xf32>
    %c0_123 = arith.constant 0 : index
    %c0_124 = arith.constant 0 : index
    %132 = vector.load %arg5[%c0_123, %c0_124] : memref<1x128xf32, #tpu.memory_space<vmem>>, vector<1x128xf32>
    %133 = vector.broadcast %132 : vector<1x128xf32> to vector<2x128xf32>
    %134 = arith.addf %131, %133 : vector<2x128xf32>
    %135 = vector.extract_strided_slice %134 {offsets = [0, 0], sizes = [2, 32], strides = [1, 1]} : vector<2x128xf32> to vector<2x32xf32>
    %136 = arith.negf %135 : vector<2x32xf32>
    %137 = math.exp %136 : vector<2x32xf32>
    %cst_125 = arith.constant 1.000000e+00 : f32
    %138 = vector.broadcast %cst_125 : f32 to vector<2x32xf32>
    %139 = arith.addf %138, %137 : vector<2x32xf32>
    %140 = arith.divf %138, %139 : vector<2x32xf32>
    %141 = vector.extract_strided_slice %134 {offsets = [0, 32], sizes = [2, 32], strides = [1, 1]} : vector<2x128xf32> to vector<2x32xf32>
    %142 = arith.negf %141 : vector<2x32xf32>
    %143 = math.exp %142 : vector<2x32xf32>
    %cst_126 = arith.constant 1.000000e+00 : f32
    %144 = vector.broadcast %cst_126 : f32 to vector<2x32xf32>
    %145 = arith.addf %144, %143 : vector<2x32xf32>
    %146 = arith.divf %144, %145 : vector<2x32xf32>
    %147 = vector.extract_strided_slice %134 {offsets = [0, 64], sizes = [2, 32], strides = [1, 1]} : vector<2x128xf32> to vector<2x32xf32>
    %148 = math.tanh %147 : vector<2x32xf32>
    %149 = vector.extract_strided_slice %134 {offsets = [0, 96], sizes = [2, 32], strides = [1, 1]} : vector<2x128xf32> to vector<2x32xf32>
    %150 = arith.negf %149 : vector<2x32xf32>
    %151 = math.exp %150 : vector<2x32xf32>
    %cst_127 = arith.constant 1.000000e+00 : f32
    %152 = vector.broadcast %cst_127 : f32 to vector<2x32xf32>
    %153 = arith.addf %152, %151 : vector<2x32xf32>
    %154 = arith.divf %152, %153 : vector<2x32xf32>
    %155 = arith.mulf %146, %78 : vector<2x32xf32>
    %156 = arith.mulf %140, %148 : vector<2x32xf32>
    %157 = arith.addf %155, %156 : vector<2x32xf32>
    %158 = math.tanh %157 : vector<2x32xf32>
    %159 = arith.mulf %154, %158 : vector<2x32xf32>
    %c2_128 = arith.constant 2 : index
    %c0_129 = arith.constant 0 : index
    %c0_130 = arith.constant 0 : index
    %c0_131 = arith.constant 0 : index
    %160 = vector.load %arg0[%c2_128, %c0_129, %c0_130, %c0_131] : memref<4x2x8x8xf32, #tpu.memory_space<vmem>>, vector<1x2x8x8xf32>
    %161 = vector.shape_cast %160 : vector<1x2x8x8xf32> to vector<2x8x8xf32>
    %c2_132 = arith.constant 2 : index
    %c0_133 = arith.constant 0 : index
    %c0_134 = arith.constant 0 : index
    %c0_135 = arith.constant 0 : index
    %162 = vector.load %arg1[%c2_132, %c0_133, %c0_134, %c0_135] : memref<4x2x8x8xf32, #tpu.memory_space<vmem>>, vector<1x2x8x8xf32>
    %163 = vector.shape_cast %162 : vector<1x2x8x8xf32> to vector<2x8x8xf32>
    %cst_136 = arith.constant dense<0.000000e+00> : vector<2x8xf32>
    %164 = vector.multi_reduction <add>, %161, %cst_136 [2] : vector<2x8x8xf32> to vector<2x8xf32>
    %165 = vector.shape_cast %164 : vector<2x8xf32> to vector<2x8x1xf32>
    %cst_137 = arith.constant 1.000000e+00 : f32
    %166 = vector.broadcast %cst_137 : f32 to vector<2x8x1xf32>
    %167 = arith.addf %165, %166 : vector<2x8x1xf32>
    %168 = math.rsqrt %167 : vector<2x8x1xf32>
    %169 = vector.broadcast %168 : vector<2x8x1xf32> to vector<2x8x8xf32>
    %170 = arith.mulf %169, %163 : vector<2x8x8xf32>
    "tpu.trace_start"() <{level = 10 : i32, message = "bij,bjf->bif"}> : () -> ()
    %cst_138 = arith.constant dense<0.000000e+00> : vector<2x8x8xf32>
    %171 = tpu.matmul %161, %170, %cst_138 {dimension_numbers = #tpu.dot_dimension_numbers<[2], [1], [1], [2], [0, 0, 0, 1, 1, 2], [0], [0]>} : vector<2x8x8xf32>, vector<2x8x8xf32>, vector<2x8x8xf32> -> vector<2x8x8xf32>
    "tpu.trace_stop"() : () -> ()
    %172 = arith.addf %171, %170 : vector<2x8x8xf32>
    %173 = vector.broadcast %168 : vector<2x8x1xf32> to vector<2x8x8xf32>
    %174 = arith.mulf %173, %172 : vector<2x8x8xf32>
    %c2_139 = arith.constant 2 : index
    %c0_140 = arith.constant 0 : index
    %c0_141 = arith.constant 0 : index
    %175 = vector.load %arg2[%c2_139, %c0_140, %c0_141] : memref<4x8x16xf32, #tpu.memory_space<vmem>>, vector<1x8x16xf32>
    %176 = vector.shape_cast %175 : vector<1x8x16xf32> to vector<8x16xf32>
    %177 = vector.shape_cast %176 : vector<8x16xf32> to vector<1x8x16xf32>
    %178 = vector.broadcast %177 : vector<1x8x16xf32> to vector<2x8x16xf32>
    "tpu.trace_start"() <{level = 10 : i32, message = "bnk,bkf->bnf"}> : () -> ()
    %cst_142 = arith.constant dense<0.000000e+00> : vector<2x8x16xf32>
    %179 = tpu.matmul %174, %178, %cst_142 {dimension_numbers = #tpu.dot_dimension_numbers<[2], [1], [1], [2], [0, 0, 0, 1, 1, 2], [0], [0]>} : vector<2x8x8xf32>, vector<2x8x16xf32>, vector<2x8x16xf32> -> vector<2x8x16xf32>
    "tpu.trace_stop"() : () -> ()
    %c0_143 = arith.constant 0 : index
    %c0_144 = arith.constant 0 : index
    %c0_145 = arith.constant 0 : index
    %180 = vector.load %arg9[%c0_143, %c0_144, %c0_145] : memref<2x8x16xf32, #tpu.memory_space<vmem>>, vector<2x8x16xf32>
    tpu.vector_store %arg9[%c0_143, %c0_144, %c0_145], %179 {strides = array<i32>} : memref<2x8x16xf32, #tpu.memory_space<vmem>>, vector<2x8x16xf32>,
    %c0_146 = arith.constant 0 : index
    %c0_147 = arith.constant 0 : index
    %c0_148 = arith.constant 0 : index
    %181 = vector.load %arg9[%c0_146, %c0_147, %c0_148] : memref<2x8x16xf32, #tpu.memory_space<vmem>>, vector<2x1x16xf32>
    %182 = vector.shape_cast %181 : vector<2x1x16xf32> to vector<2x16xf32>
    %c0_149 = arith.constant 0 : index
    %c0_150 = arith.constant 0 : index
    %183 = vector.load %arg10[%c0_149, %c0_150] : memref<2x128xf32, #tpu.memory_space<vmem>>, vector<2x16xf32>
    tpu.vector_store %arg10[%c0_149, %c0_150], %182 {strides = array<i32>} : memref<2x128xf32, #tpu.memory_space<vmem>>, vector<2x16xf32>,
    %c0_151 = arith.constant 0 : index
    %c1_152 = arith.constant 1 : index
    %c0_153 = arith.constant 0 : index
    %184 = vector.load %arg9[%c0_151, %c1_152, %c0_153] : memref<2x8x16xf32, #tpu.memory_space<vmem>>, vector<2x1x16xf32>
    %185 = vector.shape_cast %184 : vector<2x1x16xf32> to vector<2x16xf32>
    %c0_154 = arith.constant 0 : index
    %c16_155 = arith.constant 16 : index
    %186 = vector.load %arg10[%c0_154, %c16_155] : memref<2x128xf32, #tpu.memory_space<vmem>>, vector<2x16xf32>
    tpu.vector_store %arg10[%c0_154, %c16_155], %185 {strides = array<i32>} : memref<2x128xf32, #tpu.memory_space<vmem>>, vector<2x16xf32>,
    %c0_156 = arith.constant 0 : index
    %c2_157 = arith.constant 2 : index
    %c0_158 = arith.constant 0 : index
    %187 = vector.load %arg9[%c0_156, %c2_157, %c0_158] : memref<2x8x16xf32, #tpu.memory_space<vmem>>, vector<2x1x16xf32>
    %188 = vector.shape_cast %187 : vector<2x1x16xf32> to vector<2x16xf32>
    %c0_159 = arith.constant 0 : index
    %c32_160 = arith.constant 32 : index
    %189 = vector.load %arg10[%c0_159, %c32_160] : memref<2x128xf32, #tpu.memory_space<vmem>>, vector<2x16xf32>
    tpu.vector_store %arg10[%c0_159, %c32_160], %188 {strides = array<i32>} : memref<2x128xf32, #tpu.memory_space<vmem>>, vector<2x16xf32>,
    %c0_161 = arith.constant 0 : index
    %c3_162 = arith.constant 3 : index
    %c0_163 = arith.constant 0 : index
    %190 = vector.load %arg9[%c0_161, %c3_162, %c0_163] : memref<2x8x16xf32, #tpu.memory_space<vmem>>, vector<2x1x16xf32>
    %191 = vector.shape_cast %190 : vector<2x1x16xf32> to vector<2x16xf32>
    %c0_164 = arith.constant 0 : index
    %c48_165 = arith.constant 48 : index
    %192 = vector.load %arg10[%c0_164, %c48_165] : memref<2x128xf32, #tpu.memory_space<vmem>>, vector<2x16xf32>
    tpu.vector_store %arg10[%c0_164, %c48_165], %191 {strides = array<i32>} : memref<2x128xf32, #tpu.memory_space<vmem>>, vector<2x16xf32>,
    %c0_166 = arith.constant 0 : index
    %c4_167 = arith.constant 4 : index
    %c0_168 = arith.constant 0 : index
    %193 = vector.load %arg9[%c0_166, %c4_167, %c0_168] : memref<2x8x16xf32, #tpu.memory_space<vmem>>, vector<2x1x16xf32>
    %194 = vector.shape_cast %193 : vector<2x1x16xf32> to vector<2x16xf32>
    %c0_169 = arith.constant 0 : index
    %c64_170 = arith.constant 64 : index
    %195 = vector.load %arg10[%c0_169, %c64_170] : memref<2x128xf32, #tpu.memory_space<vmem>>, vector<2x16xf32>
    tpu.vector_store %arg10[%c0_169, %c64_170], %194 {strides = array<i32>} : memref<2x128xf32, #tpu.memory_space<vmem>>, vector<2x16xf32>,
    %c0_171 = arith.constant 0 : index
    %c5_172 = arith.constant 5 : index
    %c0_173 = arith.constant 0 : index
    %196 = vector.load %arg9[%c0_171, %c5_172, %c0_173] : memref<2x8x16xf32, #tpu.memory_space<vmem>>, vector<2x1x16xf32>
    %197 = vector.shape_cast %196 : vector<2x1x16xf32> to vector<2x16xf32>
    %c0_174 = arith.constant 0 : index
    %c80_175 = arith.constant 80 : index
    %198 = vector.load %arg10[%c0_174, %c80_175] : memref<2x128xf32, #tpu.memory_space<vmem>>, vector<2x16xf32>
    tpu.vector_store %arg10[%c0_174, %c80_175], %197 {strides = array<i32>} : memref<2x128xf32, #tpu.memory_space<vmem>>, vector<2x16xf32>,
    %c0_176 = arith.constant 0 : index
    %c6_177 = arith.constant 6 : index
    %c0_178 = arith.constant 0 : index
    %199 = vector.load %arg9[%c0_176, %c6_177, %c0_178] : memref<2x8x16xf32, #tpu.memory_space<vmem>>, vector<2x1x16xf32>
    %200 = vector.shape_cast %199 : vector<2x1x16xf32> to vector<2x16xf32>
    %c0_179 = arith.constant 0 : index
    %c96_180 = arith.constant 96 : index
    %201 = vector.load %arg10[%c0_179, %c96_180] : memref<2x128xf32, #tpu.memory_space<vmem>>, vector<2x16xf32>
    tpu.vector_store %arg10[%c0_179, %c96_180], %200 {strides = array<i32>} : memref<2x128xf32, #tpu.memory_space<vmem>>, vector<2x16xf32>,
    %c0_181 = arith.constant 0 : index
    %c7_182 = arith.constant 7 : index
    %c0_183 = arith.constant 0 : index
    %202 = vector.load %arg9[%c0_181, %c7_182, %c0_183] : memref<2x8x16xf32, #tpu.memory_space<vmem>>, vector<2x1x16xf32>
    %203 = vector.shape_cast %202 : vector<2x1x16xf32> to vector<2x16xf32>
    %c0_184 = arith.constant 0 : index
    %c112_185 = arith.constant 112 : index
    %204 = vector.load %arg10[%c0_184, %c112_185] : memref<2x128xf32, #tpu.memory_space<vmem>>, vector<2x16xf32>
    tpu.vector_store %arg10[%c0_184, %c112_185], %203 {strides = array<i32>} : memref<2x128xf32, #tpu.memory_space<vmem>>, vector<2x16xf32>,
    %c0_186 = arith.constant 0 : index
    %c0_187 = arith.constant 0 : index
    %205 = vector.load %arg10[%c0_186, %c0_187] : memref<2x128xf32, #tpu.memory_space<vmem>>, vector<2x128xf32>
    %c0_188 = arith.constant 0 : index
    %c0_189 = arith.constant 0 : index
    %206 = vector.load %arg3[%c0_188, %c0_189] : memref<128x128xf32, #tpu.memory_space<vmem>>, vector<128x128xf32>
    %cst_190 = arith.constant dense<0.000000e+00> : vector<2x128xf32>
    %207 = tpu.matmul %205, %206, %cst_190 {dimension_numbers = #tpu.dot_dimension_numbers<[1], [0], [0], [1], [0, 0, 1, 1], [], []>} : vector<2x128xf32>, vector<128x128xf32>, vector<2x128xf32> -> vector<2x128xf32>
    %c0_191 = arith.constant 0 : index
    %c0_192 = arith.constant 0 : index
    %208 = vector.load %arg4[%c0_191, %c0_192] : memref<32x128xf32, #tpu.memory_space<vmem>>, vector<32x128xf32>
    %cst_193 = arith.constant dense<0.000000e+00> : vector<2x128xf32>
    %209 = tpu.matmul %159, %208, %cst_193 {dimension_numbers = #tpu.dot_dimension_numbers<[1], [0], [0], [1], [0, 0, 1, 1], [], []>} : vector<2x32xf32>, vector<32x128xf32>, vector<2x128xf32> -> vector<2x128xf32>
    %210 = arith.addf %207, %209 : vector<2x128xf32>
    %c0_194 = arith.constant 0 : index
    %c0_195 = arith.constant 0 : index
    %211 = vector.load %arg5[%c0_194, %c0_195] : memref<1x128xf32, #tpu.memory_space<vmem>>, vector<1x128xf32>
    %212 = vector.broadcast %211 : vector<1x128xf32> to vector<2x128xf32>
    %213 = arith.addf %210, %212 : vector<2x128xf32>
    %214 = vector.extract_strided_slice %213 {offsets = [0, 0], sizes = [2, 32], strides = [1, 1]} : vector<2x128xf32> to vector<2x32xf32>
    %215 = arith.negf %214 : vector<2x32xf32>
    %216 = math.exp %215 : vector<2x32xf32>
    %cst_196 = arith.constant 1.000000e+00 : f32
    %217 = vector.broadcast %cst_196 : f32 to vector<2x32xf32>
    %218 = arith.addf %217, %216 : vector<2x32xf32>
    %219 = arith.divf %217, %218 : vector<2x32xf32>
    %220 = vector.extract_strided_slice %213 {offsets = [0, 32], sizes = [2, 32], strides = [1, 1]} : vector<2x128xf32> to vector<2x32xf32>
    %221 = arith.negf %220 : vector<2x32xf32>
    %222 = math.exp %221 : vector<2x32xf32>
    %cst_197 = arith.constant 1.000000e+00 : f32
    %223 = vector.broadcast %cst_197 : f32 to vector<2x32xf32>
    %224 = arith.addf %223, %222 : vector<2x32xf32>
    %225 = arith.divf %223, %224 : vector<2x32xf32>
    %226 = vector.extract_strided_slice %213 {offsets = [0, 64], sizes = [2, 32], strides = [1, 1]} : vector<2x128xf32> to vector<2x32xf32>
    %227 = math.tanh %226 : vector<2x32xf32>
    %228 = vector.extract_strided_slice %213 {offsets = [0, 96], sizes = [2, 32], strides = [1, 1]} : vector<2x128xf32> to vector<2x32xf32>
    %229 = arith.negf %228 : vector<2x32xf32>
    %230 = math.exp %229 : vector<2x32xf32>
    %cst_198 = arith.constant 1.000000e+00 : f32
    %231 = vector.broadcast %cst_198 : f32 to vector<2x32xf32>
    %232 = arith.addf %231, %230 : vector<2x32xf32>
    %233 = arith.divf %231, %232 : vector<2x32xf32>
    %234 = arith.mulf %225, %157 : vector<2x32xf32>
    %235 = arith.mulf %219, %227 : vector<2x32xf32>
    %236 = arith.addf %234, %235 : vector<2x32xf32>
    %237 = math.tanh %236 : vector<2x32xf32>
    %238 = arith.mulf %233, %237 : vector<2x32xf32>
    %c3_199 = arith.constant 3 : index
    %c0_200 = arith.constant 0 : index
    %c0_201 = arith.constant 0 : index
    %c0_202 = arith.constant 0 : index
    %239 = vector.load %arg0[%c3_199, %c0_200, %c0_201, %c0_202] : memref<4x2x8x8xf32, #tpu.memory_space<vmem>>, vector<1x2x8x8xf32>
    %240 = vector.shape_cast %239 : vector<1x2x8x8xf32> to vector<2x8x8xf32>
    %c3_203 = arith.constant 3 : index
    %c0_204 = arith.constant 0 : index
    %c0_205 = arith.constant 0 : index
    %c0_206 = arith.constant 0 : index
    %241 = vector.load %arg1[%c3_203, %c0_204, %c0_205, %c0_206] : memref<4x2x8x8xf32, #tpu.memory_space<vmem>>, vector<1x2x8x8xf32>
    %242 = vector.shape_cast %241 : vector<1x2x8x8xf32> to vector<2x8x8xf32>
    %cst_207 = arith.constant dense<0.000000e+00> : vector<2x8xf32>
    %243 = vector.multi_reduction <add>, %240, %cst_207 [2] : vector<2x8x8xf32> to vector<2x8xf32>
    %244 = vector.shape_cast %243 : vector<2x8xf32> to vector<2x8x1xf32>
    %cst_208 = arith.constant 1.000000e+00 : f32
    %245 = vector.broadcast %cst_208 : f32 to vector<2x8x1xf32>
    %246 = arith.addf %244, %245 : vector<2x8x1xf32>
    %247 = math.rsqrt %246 : vector<2x8x1xf32>
    %248 = vector.broadcast %247 : vector<2x8x1xf32> to vector<2x8x8xf32>
    %249 = arith.mulf %248, %242 : vector<2x8x8xf32>
    "tpu.trace_start"() <{level = 10 : i32, message = "bij,bjf->bif"}> : () -> ()
    %cst_209 = arith.constant dense<0.000000e+00> : vector<2x8x8xf32>
    %250 = tpu.matmul %240, %249, %cst_209 {dimension_numbers = #tpu.dot_dimension_numbers<[2], [1], [1], [2], [0, 0, 0, 1, 1, 2], [0], [0]>} : vector<2x8x8xf32>, vector<2x8x8xf32>, vector<2x8x8xf32> -> vector<2x8x8xf32>
    "tpu.trace_stop"() : () -> ()
    %251 = arith.addf %250, %249 : vector<2x8x8xf32>
    %252 = vector.broadcast %247 : vector<2x8x1xf32> to vector<2x8x8xf32>
    %253 = arith.mulf %252, %251 : vector<2x8x8xf32>
    %c3_210 = arith.constant 3 : index
    %c0_211 = arith.constant 0 : index
    %c0_212 = arith.constant 0 : index
    %254 = vector.load %arg2[%c3_210, %c0_211, %c0_212] : memref<4x8x16xf32, #tpu.memory_space<vmem>>, vector<1x8x16xf32>
    %255 = vector.shape_cast %254 : vector<1x8x16xf32> to vector<8x16xf32>
    %256 = vector.shape_cast %255 : vector<8x16xf32> to vector<1x8x16xf32>
    %257 = vector.broadcast %256 : vector<1x8x16xf32> to vector<2x8x16xf32>
    "tpu.trace_start"() <{level = 10 : i32, message = "bnk,bkf->bnf"}> : () -> ()
    %cst_213 = arith.constant dense<0.000000e+00> : vector<2x8x16xf32>
    %258 = tpu.matmul %253, %257, %cst_213 {dimension_numbers = #tpu.dot_dimension_numbers<[2], [1], [1], [2], [0, 0, 0, 1, 1, 2], [0], [0]>} : vector<2x8x8xf32>, vector<2x8x16xf32>, vector<2x8x16xf32> -> vector<2x8x16xf32>
    "tpu.trace_stop"() : () -> ()
    %c0_214 = arith.constant 0 : index
    %c0_215 = arith.constant 0 : index
    %c0_216 = arith.constant 0 : index
    %259 = vector.load %arg9[%c0_214, %c0_215, %c0_216] : memref<2x8x16xf32, #tpu.memory_space<vmem>>, vector<2x8x16xf32>
    tpu.vector_store %arg9[%c0_214, %c0_215, %c0_216], %258 {strides = array<i32>} : memref<2x8x16xf32, #tpu.memory_space<vmem>>, vector<2x8x16xf32>,
    %c0_217 = arith.constant 0 : index
    %c0_218 = arith.constant 0 : index
    %c0_219 = arith.constant 0 : index
    %260 = vector.load %arg9[%c0_217, %c0_218, %c0_219] : memref<2x8x16xf32, #tpu.memory_space<vmem>>, vector<2x1x16xf32>
    %261 = vector.shape_cast %260 : vector<2x1x16xf32> to vector<2x16xf32>
    %c0_220 = arith.constant 0 : index
    %c0_221 = arith.constant 0 : index
    %262 = vector.load %arg10[%c0_220, %c0_221] : memref<2x128xf32, #tpu.memory_space<vmem>>, vector<2x16xf32>
    tpu.vector_store %arg10[%c0_220, %c0_221], %261 {strides = array<i32>} : memref<2x128xf32, #tpu.memory_space<vmem>>, vector<2x16xf32>,
    %c0_222 = arith.constant 0 : index
    %c1_223 = arith.constant 1 : index
    %c0_224 = arith.constant 0 : index
    %263 = vector.load %arg9[%c0_222, %c1_223, %c0_224] : memref<2x8x16xf32, #tpu.memory_space<vmem>>, vector<2x1x16xf32>
    %264 = vector.shape_cast %263 : vector<2x1x16xf32> to vector<2x16xf32>
    %c0_225 = arith.constant 0 : index
    %c16_226 = arith.constant 16 : index
    %265 = vector.load %arg10[%c0_225, %c16_226] : memref<2x128xf32, #tpu.memory_space<vmem>>, vector<2x16xf32>
    tpu.vector_store %arg10[%c0_225, %c16_226], %264 {strides = array<i32>} : memref<2x128xf32, #tpu.memory_space<vmem>>, vector<2x16xf32>,
    %c0_227 = arith.constant 0 : index
    %c2_228 = arith.constant 2 : index
    %c0_229 = arith.constant 0 : index
    %266 = vector.load %arg9[%c0_227, %c2_228, %c0_229] : memref<2x8x16xf32, #tpu.memory_space<vmem>>, vector<2x1x16xf32>
    %267 = vector.shape_cast %266 : vector<2x1x16xf32> to vector<2x16xf32>
    %c0_230 = arith.constant 0 : index
    %c32_231 = arith.constant 32 : index
    %268 = vector.load %arg10[%c0_230, %c32_231] : memref<2x128xf32, #tpu.memory_space<vmem>>, vector<2x16xf32>
    tpu.vector_store %arg10[%c0_230, %c32_231], %267 {strides = array<i32>} : memref<2x128xf32, #tpu.memory_space<vmem>>, vector<2x16xf32>,
    %c0_232 = arith.constant 0 : index
    %c3_233 = arith.constant 3 : index
    %c0_234 = arith.constant 0 : index
    %269 = vector.load %arg9[%c0_232, %c3_233, %c0_234] : memref<2x8x16xf32, #tpu.memory_space<vmem>>, vector<2x1x16xf32>
    %270 = vector.shape_cast %269 : vector<2x1x16xf32> to vector<2x16xf32>
    %c0_235 = arith.constant 0 : index
    %c48_236 = arith.constant 48 : index
    %271 = vector.load %arg10[%c0_235, %c48_236] : memref<2x128xf32, #tpu.memory_space<vmem>>, vector<2x16xf32>
    tpu.vector_store %arg10[%c0_235, %c48_236], %270 {strides = array<i32>} : memref<2x128xf32, #tpu.memory_space<vmem>>, vector<2x16xf32>,
    %c0_237 = arith.constant 0 : index
    %c4_238 = arith.constant 4 : index
    %c0_239 = arith.constant 0 : index
    %272 = vector.load %arg9[%c0_237, %c4_238, %c0_239] : memref<2x8x16xf32, #tpu.memory_space<vmem>>, vector<2x1x16xf32>
    %273 = vector.shape_cast %272 : vector<2x1x16xf32> to vector<2x16xf32>
    %c0_240 = arith.constant 0 : index
    %c64_241 = arith.constant 64 : index
    %274 = vector.load %arg10[%c0_240, %c64_241] : memref<2x128xf32, #tpu.memory_space<vmem>>, vector<2x16xf32>
    tpu.vector_store %arg10[%c0_240, %c64_241], %273 {strides = array<i32>} : memref<2x128xf32, #tpu.memory_space<vmem>>, vector<2x16xf32>,
    %c0_242 = arith.constant 0 : index
    %c5_243 = arith.constant 5 : index
    %c0_244 = arith.constant 0 : index
    %275 = vector.load %arg9[%c0_242, %c5_243, %c0_244] : memref<2x8x16xf32, #tpu.memory_space<vmem>>, vector<2x1x16xf32>
    %276 = vector.shape_cast %275 : vector<2x1x16xf32> to vector<2x16xf32>
    %c0_245 = arith.constant 0 : index
    %c80_246 = arith.constant 80 : index
    %277 = vector.load %arg10[%c0_245, %c80_246] : memref<2x128xf32, #tpu.memory_space<vmem>>, vector<2x16xf32>
    tpu.vector_store %arg10[%c0_245, %c80_246], %276 {strides = array<i32>} : memref<2x128xf32, #tpu.memory_space<vmem>>, vector<2x16xf32>,
    %c0_247 = arith.constant 0 : index
    %c6_248 = arith.constant 6 : index
    %c0_249 = arith.constant 0 : index
    %278 = vector.load %arg9[%c0_247, %c6_248, %c0_249] : memref<2x8x16xf32, #tpu.memory_space<vmem>>, vector<2x1x16xf32>
    %279 = vector.shape_cast %278 : vector<2x1x16xf32> to vector<2x16xf32>
    %c0_250 = arith.constant 0 : index
    %c96_251 = arith.constant 96 : index
    %280 = vector.load %arg10[%c0_250, %c96_251] : memref<2x128xf32, #tpu.memory_space<vmem>>, vector<2x16xf32>
    tpu.vector_store %arg10[%c0_250, %c96_251], %279 {strides = array<i32>} : memref<2x128xf32, #tpu.memory_space<vmem>>, vector<2x16xf32>,
    %c0_252 = arith.constant 0 : index
    %c7_253 = arith.constant 7 : index
    %c0_254 = arith.constant 0 : index
    %281 = vector.load %arg9[%c0_252, %c7_253, %c0_254] : memref<2x8x16xf32, #tpu.memory_space<vmem>>, vector<2x1x16xf32>
    %282 = vector.shape_cast %281 : vector<2x1x16xf32> to vector<2x16xf32>
    %c0_255 = arith.constant 0 : index
    %c112_256 = arith.constant 112 : index
    %283 = vector.load %arg10[%c0_255, %c112_256] : memref<2x128xf32, #tpu.memory_space<vmem>>, vector<2x16xf32>
    tpu.vector_store %arg10[%c0_255, %c112_256], %282 {strides = array<i32>} : memref<2x128xf32, #tpu.memory_space<vmem>>, vector<2x16xf32>,
    %c0_257 = arith.constant 0 : index
    %c0_258 = arith.constant 0 : index
    %284 = vector.load %arg10[%c0_257, %c0_258] : memref<2x128xf32, #tpu.memory_space<vmem>>, vector<2x128xf32>
    %c0_259 = arith.constant 0 : index
    %c0_260 = arith.constant 0 : index
    %285 = vector.load %arg3[%c0_259, %c0_260] : memref<128x128xf32, #tpu.memory_space<vmem>>, vector<128x128xf32>
    %cst_261 = arith.constant dense<0.000000e+00> : vector<2x128xf32>
    %286 = tpu.matmul %284, %285, %cst_261 {dimension_numbers = #tpu.dot_dimension_numbers<[1], [0], [0], [1], [0, 0, 1, 1], [], []>} : vector<2x128xf32>, vector<128x128xf32>, vector<2x128xf32> -> vector<2x128xf32>
    %c0_262 = arith.constant 0 : index
    %c0_263 = arith.constant 0 : index
    %287 = vector.load %arg4[%c0_262, %c0_263] : memref<32x128xf32, #tpu.memory_space<vmem>>, vector<32x128xf32>
    %cst_264 = arith.constant dense<0.000000e+00> : vector<2x128xf32>
    %288 = tpu.matmul %238, %287, %cst_264 {dimension_numbers = #tpu.dot_dimension_numbers<[1], [0], [0], [1], [0, 0, 1, 1], [], []>} : vector<2x32xf32>, vector<32x128xf32>, vector<2x128xf32> -> vector<2x128xf32>
    %289 = arith.addf %286, %288 : vector<2x128xf32>
    %c0_265 = arith.constant 0 : index
    %c0_266 = arith.constant 0 : index
    %290 = vector.load %arg5[%c0_265, %c0_266] : memref<1x128xf32, #tpu.memory_space<vmem>>, vector<1x128xf32>
    %291 = vector.broadcast %290 : vector<1x128xf32> to vector<2x128xf32>
    %292 = arith.addf %289, %291 : vector<2x128xf32>
    %293 = vector.extract_strided_slice %292 {offsets = [0, 0], sizes = [2, 32], strides = [1, 1]} : vector<2x128xf32> to vector<2x32xf32>
    %294 = arith.negf %293 : vector<2x32xf32>
    %295 = math.exp %294 : vector<2x32xf32>
    %cst_267 = arith.constant 1.000000e+00 : f32
    %296 = vector.broadcast %cst_267 : f32 to vector<2x32xf32>
    %297 = arith.addf %296, %295 : vector<2x32xf32>
    %298 = arith.divf %296, %297 : vector<2x32xf32>
    %299 = vector.extract_strided_slice %292 {offsets = [0, 32], sizes = [2, 32], strides = [1, 1]} : vector<2x128xf32> to vector<2x32xf32>
    %300 = arith.negf %299 : vector<2x32xf32>
    %301 = math.exp %300 : vector<2x32xf32>
    %cst_268 = arith.constant 1.000000e+00 : f32
    %302 = vector.broadcast %cst_268 : f32 to vector<2x32xf32>
    %303 = arith.addf %302, %301 : vector<2x32xf32>
    %304 = arith.divf %302, %303 : vector<2x32xf32>
    %305 = vector.extract_strided_slice %292 {offsets = [0, 64], sizes = [2, 32], strides = [1, 1]} : vector<2x128xf32> to vector<2x32xf32>
    %306 = math.tanh %305 : vector<2x32xf32>
    %307 = vector.extract_strided_slice %292 {offsets = [0, 96], sizes = [2, 32], strides = [1, 1]} : vector<2x128xf32> to vector<2x32xf32>
    %308 = arith.negf %307 : vector<2x32xf32>
    %309 = math.exp %308 : vector<2x32xf32>
    %cst_269 = arith.constant 1.000000e+00 : f32
    %310 = vector.broadcast %cst_269 : f32 to vector<2x32xf32>
    %311 = arith.addf %310, %309 : vector<2x32xf32>
    %312 = arith.divf %310, %311 : vector<2x32xf32>
    %313 = arith.mulf %304, %236 : vector<2x32xf32>
    %314 = arith.mulf %298, %306 : vector<2x32xf32>
    %315 = arith.addf %313, %314 : vector<2x32xf32>
    %316 = math.tanh %315 : vector<2x32xf32>
    %317 = arith.mulf %312, %316 : vector<2x32xf32>
    %c0_270 = arith.constant 0 : index
    %c0_271 = arith.constant 0 : index
    %318 = vector.load %arg6[%c0_270, %c0_271] : memref<32x64xf32, #tpu.memory_space<vmem>>, vector<32x64xf32>
    %cst_272 = arith.constant dense<0.000000e+00> : vector<2x64xf32>
    %319 = tpu.matmul %317, %318, %cst_272 {dimension_numbers = #tpu.dot_dimension_numbers<[1], [0], [0], [1], [0, 0, 1, 1], [], []>} : vector<2x32xf32>, vector<32x64xf32>, vector<2x64xf32> -> vector<2x64xf32>
    %c0_273 = arith.constant 0 : index
    %c0_274 = arith.constant 0 : index
    %320 = vector.load %arg7[%c0_273, %c0_274] : memref<1x64xf32, #tpu.memory_space<vmem>>, vector<1x64xf32>
    %321 = vector.broadcast %320 : vector<1x64xf32> to vector<2x64xf32>
    %322 = arith.addf %319, %321 : vector<2x64xf32>
    %323 = arith.negf %322 : vector<2x64xf32>
    %324 = math.exp %323 : vector<2x64xf32>
    %cst_275 = arith.constant 1.000000e+00 : f32
    %325 = vector.broadcast %cst_275 : f32 to vector<2x64xf32>
    %326 = arith.addf %325, %324 : vector<2x64xf32>
    %327 = arith.divf %325, %326 : vector<2x64xf32>
    %c0_276 = arith.constant 0 : index
    %c0_277 = arith.constant 0 : index
    %328 = vector.load %arg8[%c0_276, %c0_277] : memref<2x64xf32, #tpu.memory_space<vmem>>, vector<2x64xf32>
    tpu.vector_store %arg8[%c0_276, %c0_277], %327 {strides = array<i32>} : memref<2x64xf32, #tpu.memory_space<vmem>>, vector<2x64xf32>,
    return
  }
}

</mosaic_0001>

<bundles_post_ra>
// kernel: generator_forward.1
= control target key start
LH: loop header
LB: loop body
LE: loop exit
PB: predicated region body
PF: predicated region fallthrough
CT: control target
= control target key end

     0   :  { %vm34_vm0 = vcmask 64512   ;;  %s3740_s0 = inlined_call_operand.vmem [shape: f32[4,2,8,8], index: 0, kind: input, shape index: {}]   ;;  %s3741_s1 = inlined_call_operand.vmem [shape: f32[4,2,8,8], index: 1, kind: input, shape index: {}]   ;;  %s3742_s2 = inlined_call_operand.vmem [shape: f32[4,8,16], index: 2, kind: input, shape index: {}]   ;;  %s3743_s3 = inlined_call_operand.vmem [shape: f32[128,128], index: 3, kind: input, shape index: {}]   ;;  %s3744_s4 = inlined_call_operand.vmem [shape: f32[32,128], index: 4, kind: input, shape index: {}]   ;;  %s3745_s5 = inlined_call_operand.vmem [shape: f32[1,128], index: 5, kind: input, shape index: {}]   ;;  %s3746_s6 = inlined_call_operand.vmem [shape: f32[32,64], index: 6, kind: input, shape index: {}]   ;;  %s3747_s7 = inlined_call_operand.vmem [shape: f32[1,64], index: 7, kind: input, shape index: {}]   ;;  %s3748_s8 = inlined_call_operand.hbm [shape: f32[2,64], index: 8, kind: output, shape index: {}]  }
   0x1   :  { %v30_v0 = vld [vmem:[%s3740_s0] sm:$0xff]  ;;  %v31_v1 = vld [vmem:[%s3740_s0 + $0x8] sm:$0xff] }
   0x2   :  { %13 = vsyncpa [#allocation5], 0  ;;  %v35_v2 = vsel %vm34_vm0, %v30_v0, 0.0  ;;  %v38_v3 = vsel %vm34_vm0, %v31_v1, 0.0  ;;  %v3042_v4 = vmov 0.0   ;;  %vm3043_vm1 = vmmov 0  }
   0x3   :  { %36 = vadd.xlane.f32.xlu0 %v35_v2  ;;  %2683 = vmatprep.subr.mxu1 %v3042_v4  ;;  %v32_v9 = vld [vmem:[%s3741_s1] sm:$0xff]  ;;  %v33_v12 = vld [vmem:[%s3741_s1 + $0x8] sm:$0xff]  ;;  %v2519_v15 = vld [vmem:[%s3740_s0 + $0x10] sm:$0xff]  ;;  %vm342_vm2 = vcmask 130048   ;;  %vm350_vm3 = vcmask 1041409   ;;  %s3044_s19 = smov 32  }
   0x4   :  { %2693 = vmatprep.subr.mxu0 %v3042_v4  ;;  %2685 = vmatprep.mubr.msk.f32.mxu1 %vm3043_vm1, %v3042_v4  ;;  %v635_v16 = vsel %vm34_vm0, %v2519_v15, 0.0  ;;  %v195_v17 = vld [vmem:[%s3742_s2] sm:$0xff]  ;;  %v2521_v28 = vld [vmem:[%s3741_s1 + $0x10] sm:$0xff]  ;;  %s3045_s20 = smov 16   ;;  %vm353_vm4 = vcmask 123904   ;;  %v3165_v53 = vld [vmem:[%s3744_s4 + $0x18] sm:$0xff] }
   0x5   :  { %2695 = vmatprep.mubr.msk.f32.mxu0 %vm3043_vm1, %v3042_v4  ;;  %636 = vadd.xlane.f32.xlu1 %v635_v16  ;;  %v3170_v54 = vld [vmem:[%s3744_s4 + $0x10] sm:$0xff]  ;;  %s3046_s25 = smov 48   ;;  %v3178_v56 = vld [vmem:[%s3744_s4 + $0x8] sm:$0xff]  ;;  %v3188_v61 = vld [vmem:[%s3744_s4] sm:$0xff]  ;;  %s3047_s30 = smov 64   ;;  %vm364_vm5 = vcmask 255104  }
   0x6   :  { %2694 = vmatpush3.msra.mxu0 %v195_v17  ;;  %s3048_s13 = smov 80   ;;  %s3049_s18 = smov 96   ;;  %v2520_v16 = vld [vmem:[%s3740_s0 + $0x18] sm:$0xff]  ;;  %vm375_vm6 = vcmask 386304   ;;  %vm386_vm7 = vcmask 517504   ;;  %vm397_vm8 = vcmask 648704  }
   0x7   :  { %39 = vadd.xlane.f32.xlu0 %v38_v3  ;;  %2749 = vmatprep.subr.mxu0 %v3042_v4  ;;  %s3050_s23 = smov 112   ;;  %vm408_vm9 = vcmask 779904   ;;  %vm419_vm10 = vcmask 911104   ;;  %vm430_vm11 = vcmask 1042304   ;;  %vm453_vm12 = vcmask 261120  }
   0x8   :  { %vm2497_vm13 = vcmask 517120  }
  0x8c   :  { %v37_v5 = vpop.xlane.xlu0 %36 }
  0x8d   :  { %v41_v6 = vadd.f32 1.0, %v37_v5  ;;  %v3205_v5 = vld [vmem:[%s3743_s3 + $0x70] sm:$0xff] }
  0x8e   :  { %v637_v26 = vpop.xlane.xlu1 %636 }
  0x8f   :  { %2968 = vrsqrt.f32 %v41_v6  ;;  %v641_v27 = vadd.f32 1.0, %v637_v26  ;;  %v3213_v6 = vld [vmem:[%s3743_s3 + $0x68] sm:$0xff] }
  0x90   :  { %v40_v7 = vpop.xlane.xlu0 %39  ;;  %v3309_v26 = vld [vmem:[%s3743_s3 + $0x8] sm:$0xff] }
  0x91   :  { %v42_v8 = vadd.f32 1.0, %v40_v7 }
  0x93   :  { %2970 = vrsqrt.f32 %v42_v8 }
  0x94   :  { %2972 = vrsqrt.f32 %v641_v27  ;;  %v3314_v27 = vld [vmem:[%s3743_s3] sm:$0xff] }
  0x9c   :  { %v2969_v10 = vpop.eup %2968 }
  0x9d   :  { %v45_v11 = vmul.f32 %v2969_v10, %v32_v9  ;;  %v3223_v9 = vld [vmem:[%s3743_s3 + $0x60] sm:$0xff] }
  0x9f   :  { %2684 = vmatpush3.msra.mxu1 %v45_v11 }
  0xa0   :  { %v2971_v13 = vpop.eup %2970  ;;  %2686 = vmatmul.mubr.msk.f32.vlgmr.msra.gmra.mxu1 %vm34_vm0, %v30_v0  ;;  %2688 = vmatprep.subr.mxu1 %v3042_v4  ;;  %v3196_v0 = vld [vmem:[%s3743_s3 + $0x78] sm:$0xff] }
  0xa1   :  { %v46_v14 = vmul.f32 %v2971_v13, %v33_v12  ;;  %2690 = vmatprep.mubr.msk.f32.mxu1 %vm3043_vm1, %v3042_v4  ;;  %v3143_v29 = vpop.eup %2972  ;;  %v3245_v12 = vld [vmem:[%s3743_s3 + $0x48] sm:$0xff] }
  0xa2   :  { %v3146_v30 = vmul.f32 %v3143_v29, %v2521_v28 }
  0xa3   :  { %2689 = vmatpush3.msra.mxu1 %v46_v14 }
  0xa4   :  { %2691 = vmatmul.mubr.msk.f32.vlgmr.msra.gmra.mxu1 %vm34_vm0, %v31_v1  ;;  %2698 = vmatprep.subr.mxu1 %v3042_v4 }
  0xa5   :  { %2700 = vmatprep.mubr.msk.f32.mxu1 %vm3043_vm1, %v3042_v4  ;;  %2699 = vmatpush3.msra.mxu1 %v195_v17  ;;  %v638_v17 = vsel %vm34_vm0, %v2520_v16, 0.0 }
  0xa6   :  { %2703 = vmatprep.subr.mxu1 %v3042_v4 }
 0x160   :  { %v116_v18 = vpop.f32.mrf.mxu1 }
 0x161   :  { %v117_v19 = vadd.f32 %v116_v18, %v45_v11  ;;  %v3238_v11 = vld [vmem:[%s3743_s3 + $0x50] sm:$0xff] }
 0x162   :  { %v2687_v20 = vpop.f32.mrf.mxu1 }
 0x163   :  { %v193_v21 = vmul.f32 %v2969_v10, %v117_v19  ;;  %v3231_v10 = vld [vmem:[%s3743_s3 + $0x58] sm:$0xff]  ;;  %v3279_v20 = vld [vmem:[%s3743_s3 + $0x28] sm:$0xff] }
 0x164   :  { %v189_v22 = vpop.f32.mrf.mxu1 }
 0x165   :  { %v190_v23 = vadd.f32 %v189_v22, %v46_v14  ;;  %2696 = vmatmul.mubr.msk.f32.vlgmr.msra.gmra.mxu0 %vm34_vm0, %v193_v21  ;;  %v3259_v14 = vld [vmem:[%s3743_s3 + $0x38] sm:$0xff]  ;;  %v3284_v21 = vld [vmem:[%s3743_s3 + $0x20] sm:$0xff] }
 0x166   :  { %v2692_v24 = vpop.f32.mrf.mxu1  ;;  %2751 = vmatprep.mubr.msk.f32.mxu0 %vm3043_vm1, %v3042_v4  ;;  %2750 = vmatpush3.msra.mxu0 %v3146_v30 }
 0x167   :  { %v194_v25 = vmul.f32 %v2971_v13, %v190_v23  ;;  %2754 = vmatprep.subr.mxu0 %v3042_v4  ;;  %v3252_v13 = vld [vmem:[%s3743_s3 + $0x40] sm:$0xff]  ;;  %v3295_v24 = vld [vmem:[%s3743_s3 + $0x18] sm:$0xff] }
 0x169   :  { %2701 = vmatmul.mubr.msk.f32.vlgmr.msra.gmra.mxu1 %vm34_vm0, %v194_v25  ;;  %2752 = vmatmul.mubr.msk.f32.vlgmr.msra.gmra.mxu0 %vm34_vm0, %v2519_v15  ;;  %v3266_v15 = vld [vmem:[%s3743_s3 + $0x30] sm:$0xff] }
 0x16a   :  { %2711 = vmatprep.mubr.msk.f32.mxu1 %vm3043_vm1, %v3042_v4  ;;  %2756 = vmatprep.mubr.msk.f32.mxu0 %vm3043_vm1, %v3042_v4  ;;  %v3302_v25 = vld [vmem:[%s3743_s3 + $0x10] sm:$0xff] }
 0x16b   :  { %2704 = vmatpush3.msra.mxu1 %v3165_v53 }
 0x16c   :  { %2705 = vmatprep.subr.mxu1 %v3042_v4 }
 0x16d   :  { %2706 = vmatpush3.msra.mxu1 %v3170_v54 }
 0x16e   :  { %2707 = vmatprep.subr.mxu1 %v3042_v4 }
 0x16f   :  { %2708 = vmatpush3.msra.mxu1 %v3178_v56 }
 0x170   :  { %2709 = vmatprep.subr.mxu1 %v3042_v4 }
 0x171   :  { %2710 = vmatpush3.msra.mxu1 %v3188_v61 }
 0x172   :  { %2714 = vmatprep.subr.mxu1 %v3042_v4  ;;  %2712 = vmatmul.mubr.f32.vlgmr.msra.gmra.mxu1 %v3042_v4 }
 0x173   :  { %2715 = vmatpush3.msra.mxu1 %v3196_v0  ;;  %2746 = vmatprep.mubr.msk.f32.mxu1 %vm3043_vm1, %v3042_v4 }
 0x174   :  { %2716 = vmatprep.subr.mxu1 %v3042_v4 }
 0x175   :  { %2717 = vmatpush3.msra.mxu1 %v3205_v5 }
 0x176   :  { %2718 = vmatprep.subr.mxu1 %v3042_v4 }
 0x177   :  { %2719 = vmatpush3.msra.mxu1 %v3213_v6 }
 0x178   :  { %2720 = vmatprep.subr.mxu1 %v3042_v4 }
 0x179   :  { %2721 = vmatpush3.msra.mxu1 %v3223_v9 }
 0x17a   :  { %2722 = vmatprep.subr.mxu1 %v3042_v4 }
 0x17b   :  { %2723 = vmatpush3.msra.mxu1 %v3231_v10 }
 0x17c   :  { %2724 = vmatprep.subr.mxu1 %v3042_v4 }
 0x17d   :  { %2725 = vmatpush3.msra.mxu1 %v3238_v11 }
 0x17e   :  { %2726 = vmatprep.subr.mxu1 %v3042_v4 }
 0x17f   :  { %2727 = vmatpush3.msra.mxu1 %v3245_v12 }
 0x180   :  { %2728 = vmatprep.subr.mxu1 %v3042_v4 }
 0x181   :  { %2729 = vmatpush3.msra.mxu1 %v3252_v13 }
 0x182   :  { %2730 = vmatprep.subr.mxu1 %v3042_v4 }
 0x183   :  { %2731 = vmatpush3.msra.mxu1 %v3259_v14 }
 0x184   :  { %2732 = vmatprep.subr.mxu1 %v3042_v4 }
 0x185   :  { %2733 = vmatpush3.msra.mxu1 %v3266_v15 }
 0x186   :  { %2734 = vmatprep.subr.mxu1 %v3042_v4 }
 0x187   :  { %2735 = vmatpush3.msra.mxu1 %v3279_v20 }
 0x188   :  { %2736 = vmatprep.subr.mxu1 %v3042_v4 }
 0x189   :  { %2737 = vmatpush3.msra.mxu1 %v3284_v21 }
 0x18a   :  { %2738 = vmatprep.subr.mxu1 %v3042_v4 }
 0x18b   :  { %2739 = vmatpush3.msra.mxu1 %v3295_v24 }
 0x18c   :  { %2740 = vmatprep.subr.mxu1 %v3042_v4 }
 0x18d   :  { %2741 = vmatpush3.msra.mxu1 %v3302_v25 }
 0x18e   :  { %2742 = vmatprep.subr.mxu1 %v3042_v4 }
 0x18f   :  { %2743 = vmatpush3.msra.mxu1 %v3309_v26 }
 0x190   :  { %2744 = vmatprep.subr.mxu1 %v3042_v4 }
 0x191   :  { %2745 = vmatpush3.msra.mxu1 %v3314_v27 }
 0x192   :  { %2815 = vmatprep.subr.mxu1 %v3042_v4 }
 0x225   :  { %v265_v31 = vpop.f32.mrf.mxu0 }
 0x226   :  { %343 = vst.msk [vmem:[#allocation2] sm:$0xff] %vm342_vm2, %v265_v31 }
 0x227   :  { %v2697_v32 = vpop.f32.mrf.mxu0 }
 0x229   :  { %v338_v33 = vpop.f32.mrf.mxu1  ;;  %v3180_v58 = vpop.f32.mrf.mxu0 }
 0x22a   :  { %344 = vst.msk [vmem:[#allocation2 + $0x8] sm:$0xff] %vm342_vm2, %v338_v33 }
 0x22b   :  { %v2702_v34 = vpop.f32.mrf.mxu1  ;;  %v2753_v63 = vpop.f32.mrf.mxu0 }
 0x22d   :  { %v366_v40 = vld [vmem:[#allocation2 + $0x2] sm:$0x1]  ;;  %v355_v41 = vld [vmem:[#allocation2 + $0x1] sm:$0x1]  ;;  %v345_v48 = vld [vmem:[#allocation2] sm:$0x1] }
 0x22e   :  { %v377_v49 = vld [vmem:[#allocation2 + $0x3] sm:$0x1]  ;;  %v388_v57 = vld [vmem:[#allocation2 + $0x4] sm:$0x1]  ;;  %v399_v1 = vld [vmem:[#allocation2 + $0x5] sm:$0x1] }
 0x22f   :  { %v410_v7 = vld [vmem:[#allocation2 + $0x6] sm:$0x1]  ;;  %v421_v22 = vld [vmem:[#allocation2 + $0x7] sm:$0x1] }
 0x231   :  { %v367_v35 = vld [vmem:[#allocation2 + $0xa] sm:$0x1]  ;;  %v356_v36 = vld [vmem:[#allocation2 + $0x9] sm:$0x1]  ;;  %v378_v37 = vld [vmem:[#allocation2 + $0xb] sm:$0x1] }
 0x232   :  { %v370_v38 = vrot.slane %v367_v35, 7  ;;  %v359_v39 = vrot.slane %v356_v36, 7  ;;  %v381_v44 = vrot.slane %v378_v37, 7  ;;  %v346_v45 = vld [vmem:[#allocation2 + $0x8] sm:$0x1] }
 0x233   :  { %v389_v46 = vld [vmem:[#allocation2 + $0xc] sm:$0x1]  ;;  %v349_v47 = vrot.slane %v346_v45, 7  ;;  %v400_v55 = vld [vmem:[#allocation2 + $0xd] sm:$0x1] }
 0x234   :  { %v371_v42 = vsel %vm350_vm3, %v370_v38, %v366_v40  ;;  %v360_v43 = vsel %vm350_vm3, %v359_v39, %v355_v41  ;;  %v382_v51 = vsel %vm350_vm3, %v381_v44, %v377_v49  ;;  %v392_v52 = vrot.slane %v389_v46, 7  ;;  %v411_v62 = vld [vmem:[#allocation2 + $0xe] sm:$0x1]  ;;  %v422_v18 = vld [vmem:[#allocation2 + $0xf] sm:$0x1]  ;;  %v2522_v40 = vld [vmem:[%s3741_s1 + $0x18] sm:$0xff] }
 0x235   :  { %372 = vrot.lane.b32.xlu0 %v371_v42, %s3044_s19  ;;  %361 = vrot.lane.b32.xlu1 %v360_v43, %s3045_s20  ;;  %v351_v50 = vsel %vm350_vm3, %v349_v47, %v345_v48  ;;  %v403_v60 = vrot.slane %v400_v55, 7  ;;  %v414_v3 = vrot.slane %v411_v62, 7  ;;  %v425_v19 = vrot.slane %v422_v18, 7  ;;  %v2525_v44 = vld [vmem:[%s3742_s2 + $0x8] sm:$0xff]  ;;  %v3350_v48 = vld [vmem:[%s3745_s5] ss:$0 sm:$0xff] }
 0x236   :  { %354 = vst.msk [vmem:[#allocation3] sm:$0x3] %vm353_vm4, %v351_v50  ;;  %v393_v59 = vsel %vm350_vm3, %v392_v52, %v388_v57  ;;  %v717_v43 = vadd.f32 %v3180_v58, %v3146_v30  ;;  %v523_v30 = vpop.f32.mrf.mxu1 }
 0x237   :  { %v404_v2 = vsel %vm350_vm3, %v403_v60, %v399_v1  ;;  %v415_v8 = vsel %vm350_vm3, %v414_v3, %v410_v7  ;;  %v426_v23 = vsel %vm350_vm3, %v425_v19, %v421_v22 }
 0x238   :  { %v793_v45 = vmul.f32 %v3143_v29, %v717_v43  ;;  %v2713_v46 = vpop.f32.mrf.mxu1 }
 0x239   :  { %383 = vrot.lane.b32.xlu0 %v382_v51, %s3046_s25 }
 0x23d   :  { %394 = vrot.lane.b32.xlu0 %v393_v59, %s3047_s30 }
 0x241   :  { %405 = vrot.lane.b32.xlu0 %v404_v2, %s3048_s13 }
 0x245   :  { %416 = vrot.lane.b32.xlu0 %v415_v8, %s3049_s18 }
 0x259   :  { %639 = vadd.xlane.f32.xlu1 %v638_v17 }
 0x26a   :  { %427 = vrot.lane.b32.xlu1 %v426_v23, %s3050_s23 }
 0x2a7   :  { %v373_v28 = vpop.permute.xlu0 %372  ;;  %v362_v31 = vpop.permute.xlu1 %361 }
 0x2a8   :  { %365 = vst.msk [vmem:[#allocation3] sm:$0x3] %vm364_vm5, %v362_v31 }
 0x2a9   :  { %376 = vst.msk [vmem:[#allocation3] sm:$0x3] %vm375_vm6, %v373_v28 }
 0x2ab   :  { %v384_v32 = vpop.permute.xlu0 %383 }
 0x2ac   :  { %387 = vst.msk [vmem:[#allocation3] sm:$0x3] %vm386_vm7, %v384_v32 }
 0x2af   :  { %v395_v33 = vpop.permute.xlu0 %394 }
 0x2b0   :  { %398 = vst.msk [vmem:[#allocation3] sm:$0x3] %vm397_vm8, %v395_v33 }
 0x2b3   :  { %v406_v34 = vpop.permute.xlu0 %405 }
 0x2b4   :  { %409 = vst.msk [vmem:[#allocation3] sm:$0x3] %vm408_vm9, %v406_v34 }
 0x2b7   :  { %v417_v35 = vpop.permute.xlu0 %416 }
 0x2b8   :  { %420 = vst.msk [vmem:[#allocation3] sm:$0x3] %vm419_vm10, %v417_v35 }
 0x2e2   :  { %v640_v36 = vpop.xlane.xlu1 %639 }
 0x2e3   :  { %v642_v37 = vadd.f32 1.0, %v640_v36 }
 0x2e5   :  { %2974 = vrsqrt.f32 %v642_v37 }
 0x2e6   :  { %v428_v38 = vpop.permute.xlu1 %427 }
 0x2e7   :  { %431 = vst.msk [vmem:[#allocation3] sm:$0x3] %vm430_vm11, %v428_v38 }
 0x2ee   :  { %v432_v39 = vld [vmem:[#allocation3] sm:$0x3] }
 0x2ef   :  { %2747 = vmatmul.mubr.f32.vlgmr.msra.gmra.mxu1 %v432_v39 }
 0x2f0   :  { %2817 = vmatprep.mubr.msk.f32.mxu1 %vm3043_vm1, %v3042_v4 }
 0x2f2   :  { %v2975_v41 = vpop.eup %2974 }
 0x2f3   :  { %v646_v42 = vmul.f32 %v2975_v41, %v2522_v40 }
 0x2f5   :  { %2755 = vmatpush3.msra.mxu0 %v646_v42 }
 0x2f6   :  { %2757 = vmatmul.mubr.msk.f32.vlgmr.msra.gmra.mxu0 %vm34_vm0, %v2520_v16  ;;  %2759 = vmatprep.subr.mxu0 %v3042_v4 }
 0x2f7   :  { %2760 = vmatpush3.msra.mxu0 %v2525_v44  ;;  %2761 = vmatprep.mubr.msk.f32.mxu0 %vm3043_vm1, %v3042_v4 }
 0x2f8   :  { %2764 = vmatprep.subr.mxu0 %v3042_v4 }
 0x2fa   :  { %2762 = vmatmul.mubr.msk.f32.vlgmr.msra.gmra.mxu0 %vm34_vm0, %v793_v45 }
 0x2fb   :  { %2765 = vmatpush3.msra.mxu0 %v2525_v44  ;;  %2766 = vmatprep.mubr.msk.f32.mxu0 %vm3043_vm1, %v3042_v4 }
 0x2fc   :  { %2769 = vmatprep.subr.mxu0 %v3042_v4 }
 0x3af   :  { %v593_v47 = vpop.f32.mrf.mxu1 }
 0x3b0   :  { %v594_v49 = vadd.f32 %v593_v47, %v523_v30 }
 0x3b1   :  { %v2748_v29 = vpop.f32.mrf.mxu1 }
 0x3b2   :  { %v604_v50 = vadd.f32 %v3350_v48, %v594_v49 }
 0x3b4   :  { %2976 = vtanh.f32 %v604_v50  ;;  %v2518_v62 = vmul.f32 -1.442695, %v604_v50 }
 0x3b6   :  { %v789_v51 = vpop.f32.mrf.mxu0  ;;  %2978 = vpow2.f32 %v2518_v62 }
 0x3b7   :  { %v790_v52 = vadd.f32 %v789_v51, %v646_v42 }
 0x3b8   :  { %v2758_v55 = vpop.f32.mrf.mxu0 }
 0x3b9   :  { %v794_v57 = vmul.f32 %v2975_v41, %v790_v52  ;;  %v3387_v52 = vld [vmem:[%s3740_s0 + $0x28] sm:$0xff] }
 0x3ba   :  { %v866_v58 = vpop.f32.mrf.mxu0  ;;  %v1230_v55 = vsel %vm34_vm0, %v3387_v52, 0.0 }
 0x3bb   :  { %943 = vst.msk [vmem:[#allocation2] sm:$0xff] %vm342_vm2, %v866_v58  ;;  %2767 = vmatmul.mubr.msk.f32.vlgmr.msra.gmra.mxu0 %vm34_vm0, %v794_v57 }
 0x3bc   :  { %v2763_v59 = vpop.f32.mrf.mxu0  ;;  %2770 = vmatpush3.msra.mxu0 %v3165_v53  ;;  %2777 = vmatprep.mubr.msk.f32.mxu0 %vm3043_vm1, %v3042_v4 }
 0x3bd   :  { %2771 = vmatprep.subr.mxu0 %v3042_v4 }
 0x3be   :  { %2772 = vmatpush3.msra.mxu0 %v3170_v54 }
 0x3bf   :  { %2773 = vmatprep.subr.mxu0 %v3042_v4 }
 0x3c0   :  { %2774 = vmatpush3.msra.mxu0 %v3178_v56 }
 0x3c1   :  { %v2977_v60 = vpop.eup %2976  ;;  %2775 = vmatprep.subr.mxu0 %v3042_v4 }
 0x3c2   :  { %614 = vrot.lane.b32.xlu0 %v2977_v60, %s3047_s30  ;;  %2776 = vmatpush3.msra.mxu0 %v3188_v61  ;;  %v953_v22 = vld [vmem:[#allocation2 + $0x1] sm:$0x1]  ;;  %v945_v34 = vld [vmem:[#allocation2] sm:$0x1]  ;;  %v963_v35 = vld [vmem:[#allocation2 + $0x2] sm:$0x1] }
 0x3c3   :  { %2780 = vmatprep.subr.mxu0 %v3042_v4  ;;  %v2979_v63 = vpop.eup %2978  ;;  %v973_v40 = vld [vmem:[#allocation2 + $0x3] sm:$0x1]  ;;  %v983_v44 = vld [vmem:[#allocation2 + $0x4] sm:$0x1]  ;;  %v993_v46 = vld [vmem:[#allocation2 + $0x5] sm:$0x1] }
 0x3c4   :  { %v608_v1 = vadd.f32 1.0, %v2979_v63 }
 0x3c6   :  { %2980 = vrcp.f32 %v608_v1 }
 0x3d3   :  { %v2981_v2 = vpop.eup %2980 }
 0x3d4   :  { %v612_v49 = vmul.f32 0.0, %v2981_v2 }
 0x434   :  { %v615_v3 = vpop.permute.xlu0 %614 }
 0x435   :  { %v617_v7 = vmul.f32 %v2981_v2, %v615_v3  ;;  %v3400_v3 = vld [vmem:[%s3740_s0 + $0x20] sm:$0xff] }
 0x437   :  { %619 = vrot.lane.b32.xlu0 %v617_v7, %s3044_s19  ;;  %v1227_v7 = vsel %vm34_vm0, %v3400_v3, 0.0 }
 0x47b   :  { %v939_v8 = vpop.f32.mrf.mxu0 }
 0x47c   :  { %944 = vst.msk [vmem:[#allocation2 + $0x8] sm:$0xff] %vm342_vm2, %v939_v8 }
 0x47d   :  { %v2768_v16 = vpop.f32.mrf.mxu0 }
 0x483   :  { %v954_v17 = vld [vmem:[#allocation2 + $0x9] sm:$0x1]  ;;  %v964_v18 = vld [vmem:[#allocation2 + $0xa] sm:$0x1]  ;;  %v946_v23 = vld [vmem:[#allocation2 + $0x8] sm:$0x1] }
 0x484   :  { %v957_v19 = vrot.slane %v954_v17, 7  ;;  %v967_v31 = vrot.slane %v964_v18, 7  ;;  %v974_v32 = vld [vmem:[#allocation2 + $0xb] sm:$0x1]  ;;  %v949_v33 = vrot.slane %v946_v23, 7 }
 0x485   :  { %v977_v38 = vrot.slane %v974_v32, 7  ;;  %v984_v39 = vld [vmem:[#allocation2 + $0xc] sm:$0x1]  ;;  %v994_v43 = vld [vmem:[#allocation2 + $0xd] sm:$0x1] }
 0x486   :  { %v958_v28 = vsel %vm350_vm3, %v957_v19, %v953_v22  ;;  %v950_v36 = vsel %vm350_vm3, %v949_v33, %v945_v34  ;;  %v968_v37 = vsel %vm350_vm3, %v967_v31, %v963_v35  ;;  %v987_v42 = vrot.slane %v984_v39, 7  ;;  %v1004_v8 = vld [vmem:[#allocation2 + $0xe] sm:$0x1]  ;;  %v1014_v17 = vld [vmem:[#allocation2 + $0xf] sm:$0x1] }
 0x487   :  { %959 = vrot.lane.b32.xlu1 %v958_v28, %s3045_s20  ;;  %952 = vst.msk [vmem:[#allocation3] sm:$0x3] %vm353_vm4, %v950_v36  ;;  %v978_v41 = vsel %vm350_vm3, %v977_v38, %v973_v40  ;;  %v997_v30 = vrot.slane %v994_v43, 7  ;;  %v1007_v16 = vrot.slane %v1004_v8, 7  ;;  %v1003_v18 = vld [vmem:[#allocation2 + $0x6] sm:$0x1] }
 0x488   :  { %v988_v45 = vsel %vm350_vm3, %v987_v42, %v983_v44  ;;  %v1017_v22 = vrot.slane %v1014_v17, 7  ;;  %v2533_v38 = vld [vmem:[%s3741_s1 + $0x20] sm:$0xff]  ;;  %v2534_v39 = vld [vmem:[%s3741_s1 + $0x28] sm:$0xff]  ;;  %v2537_v44 = vld [vmem:[%s3742_s2 + $0x10] sm:$0xff] }
 0x489   :  { %v998_v47 = vsel %vm350_vm3, %v997_v30, %v993_v46  ;;  %v1008_v19 = vsel %vm350_vm3, %v1007_v16, %v1003_v18 }
 0x48b   :  { %969 = vrot.lane.b32.xlu1 %v968_v37, %s3044_s19 }
 0x48f   :  { %979 = vrot.lane.b32.xlu1 %v978_v41, %s3046_s25 }
 0x493   :  { %989 = vrot.lane.b32.xlu1 %v988_v45, %s3047_s30 }
 0x497   :  { %999 = vrot.lane.b32.xlu1 %v998_v47, %s3048_s13 }
 0x4a9   :  { %v620_v29 = vpop.permute.xlu0 %619 }
 0x4aa   :  { %v3380_v50 = vadd.f32 %v620_v29, %v612_v49 }
 0x4ac   :  { %2982 = vtanh.f32 %v3380_v50 }
 0x4b9   :  { %v2983_v51 = vpop.eup %2982 }
 0x4ba   :  { %625 = vrot.lane.b32.xlu0 %v2983_v51, %s3047_s30 }
 0x4bb   :  { %1231 = vadd.xlane.f32.xlu1 %v1230_v55 }
 0x4f9   :  { %v960_v57 = vpop.permute.xlu1 %959 }
 0x4fa   :  { %962 = vst.msk [vmem:[#allocation3] sm:$0x3] %vm364_vm5, %v960_v57 }
 0x4fd   :  { %v970_v58 = vpop.permute.xlu1 %969 }
 0x4fe   :  { %972 = vst.msk [vmem:[#allocation3] sm:$0x3] %vm375_vm6, %v970_v58 }
 0x501   :  { %v980_v59 = vpop.permute.xlu1 %979 }
 0x502   :  { %982 = vst.msk [vmem:[#allocation3] sm:$0x3] %vm386_vm7, %v980_v59 }
 0x505   :  { %v990_v60 = vpop.permute.xlu1 %989 }
 0x506   :  { %992 = vst.msk [vmem:[#allocation3] sm:$0x3] %vm397_vm8, %v990_v60 }
 0x509   :  { %v1000_v62 = vpop.permute.xlu1 %999 }
 0x50a   :  { %1002 = vst.msk [vmem:[#allocation3] sm:$0x3] %vm408_vm9, %v1000_v62 }
 0x52c   :  { %v626_v63 = vpop.permute.xlu0 %625 }
 0x52d   :  { %v628_v1 = vmul.f32 %v2981_v2, %v626_v63  ;;  %v1013_v2 = vld [vmem:[#allocation2 + $0x7] sm:$0x1] }
 0x52e   :  { %v1018_v23 = vsel %vm350_vm3, %v1017_v22, %v1013_v2 }
 0x52f   :  { %1045 = vrot.lane.b32.xlu0 %v628_v1, %s3044_s19 }
 0x544   :  { %v1232_v31 = vpop.xlane.xlu1 %1231 }
 0x545   :  { %v1234_v32 = vadd.f32 1.0, %v1232_v31 }
 0x547   :  { %2984 = vrsqrt.f32 %v1234_v32 }
 0x54e   :  { %1228 = vadd.xlane.f32.xlu0 %v1227_v7 }
 0x554   :  { %v2985_v37 = vpop.eup %2984 }
 0x555   :  { %v1238_v43 = vmul.f32 %v2985_v37, %v2534_v39 }
 0x564   :  { %1009 = vrot.lane.b32.xlu0 %v1008_v19, %s3049_s18 }
 0x568   :  { %1019 = vrot.lane.b32.xlu0 %v1018_v23, %s3050_s23  ;;  %v2545_v23 = vld [vmem:[%s3741_s1 + $0x30] sm:$0xff] }
 0x5a1   :  { %v1046_v28 = vpop.permute.xlu0 %1045 }
 0x5a2   :  { %2778 = vmatmul.mubr.msk.f32.vlgmr.msra.gmra.mxu0 %vm453_vm12, %v1046_v28 }
 0x5a3   :  { %2781 = vmatpush3.msra.mxu0 %v3196_v0  ;;  %2812 = vmatprep.mubr.msk.f32.mxu0 %vm3043_vm1, %v3042_v4 }
 0x5a4   :  { %2782 = vmatprep.subr.mxu0 %v3042_v4 }
 0x5a5   :  { %2783 = vmatpush3.msra.mxu0 %v3205_v5 }
 0x5a6   :  { %2784 = vmatprep.subr.mxu0 %v3042_v4 }
 0x5a7   :  { %2785 = vmatpush3.msra.mxu0 %v3213_v6 }
 0x5a8   :  { %2786 = vmatprep.subr.mxu0 %v3042_v4 }
 0x5a9   :  { %2787 = vmatpush3.msra.mxu0 %v3223_v9 }
 0x5aa   :  { %2788 = vmatprep.subr.mxu0 %v3042_v4 }
 0x5ab   :  { %2789 = vmatpush3.msra.mxu0 %v3231_v10 }
 0x5ac   :  { %2790 = vmatprep.subr.mxu0 %v3042_v4 }
 0x5ad   :  { %2791 = vmatpush3.msra.mxu0 %v3238_v11 }
 0x5ae   :  { %2792 = vmatprep.subr.mxu0 %v3042_v4 }
 0x5af   :  { %2793 = vmatpush3.msra.mxu0 %v3245_v12 }
 0x5b0   :  { %2794 = vmatprep.subr.mxu0 %v3042_v4 }
 0x5b1   :  { %2795 = vmatpush3.msra.mxu0 %v3252_v13 }
 0x5b2   :  { %2796 = vmatprep.subr.mxu0 %v3042_v4 }
 0x5b3   :  { %2797 = vmatpush3.msra.mxu0 %v3259_v14 }
 0x5b4   :  { %2798 = vmatprep.subr.mxu0 %v3042_v4 }
 0x5b5   :  { %2799 = vmatpush3.msra.mxu0 %v3266_v15 }
 0x5b6   :  { %2800 = vmatprep.subr.mxu0 %v3042_v4 }
 0x5b7   :  { %2801 = vmatpush3.msra.mxu0 %v3279_v20 }
 0x5b8   :  { %2802 = vmatprep.subr.mxu0 %v3042_v4 }
 0x5b9   :  { %2803 = vmatpush3.msra.mxu0 %v3284_v21 }
 0x5ba   :  { %2804 = vmatprep.subr.mxu0 %v3042_v4 }
 0x5bb   :  { %2805 = vmatpush3.msra.mxu0 %v3295_v24 }
 0x5bc   :  { %2806 = vmatprep.subr.mxu0 %v3042_v4 }
 0x5bd   :  { %2807 = vmatpush3.msra.mxu0 %v3302_v25 }
 0x5be   :  { %2808 = vmatprep.subr.mxu0 %v3042_v4 }
 0x5bf   :  { %2809 = vmatpush3.msra.mxu0 %v3309_v26 }
 0x5c0   :  { %2810 = vmatprep.subr.mxu0 %v3042_v4 }
 0x5c1   :  { %2811 = vmatpush3.msra.mxu0 %v3314_v27 }
 0x5c2   :  { %2881 = vmatprep.subr.mxu0 %v3042_v4 }
 0x5d7   :  { %v1229_v33 = vpop.xlane.xlu0 %1228 }
 0x5d8   :  { %v1233_v34 = vadd.f32 1.0, %v1229_v33 }
 0x5da   :  { %2986 = vrsqrt.f32 %v1233_v34 }
 0x5db   :  { %v1010_v35 = vpop.permute.xlu0 %1009 }
 0x5dc   :  { %1012 = vst.msk [vmem:[#allocation3] sm:$0x3] %vm419_vm10, %v1010_v35 }
 0x5df   :  { %v1020_v36 = vpop.permute.xlu0 %1019 }
 0x5e0   :  { %1022 = vst.msk [vmem:[#allocation3] sm:$0x3] %vm430_vm11, %v1020_v36 }
 0x5e7   :  { %v2987_v40 = vpop.eup %2986  ;;  %v1023_v41 = vld [vmem:[#allocation3] sm:$0x3] }
 0x5e8   :  { %2813 = vmatmul.mubr.f32.vlgmr.msra.gmra.mxu0 %v1023_v41  ;;  %v1237_v42 = vmul.f32 %v2987_v40, %v2533_v38 }
 0x5e9   :  { %2883 = vmatprep.mubr.msk.f32.mxu0 %vm3043_vm1, %v3042_v4 }
 0x5ea   :  { %2816 = vmatpush3.msra.mxu1 %v1237_v42 }
 0x5eb   :  { %2818 = vmatmul.mubr.msk.f32.vlgmr.msra.gmra.mxu1 %vm34_vm0, %v3400_v3  ;;  %2820 = vmatprep.subr.mxu1 %v3042_v4 }
 0x5ec   :  { %2821 = vmatpush3.msra.mxu1 %v1238_v43  ;;  %2822 = vmatprep.mubr.msk.f32.mxu1 %vm3043_vm1, %v3042_v4 }
 0x5ed   :  { %2825 = vmatprep.subr.mxu1 %v3042_v4 }
 0x5ef   :  { %2823 = vmatmul.mubr.msk.f32.vlgmr.msra.gmra.mxu1 %vm34_vm0, %v3387_v52 }
 0x5f0   :  { %2827 = vmatprep.mubr.msk.f32.mxu1 %vm3043_vm1, %v3042_v4  ;;  %2826 = vmatpush3.msra.mxu1 %v2537_v44 }
 0x5f1   :  { %2830 = vmatprep.subr.mxu1 %v3042_v4 }
 0x662   :  { %v1115_v45 = vpop.f32.mrf.mxu0 }
 0x664   :  { %v2779_v30 = vpop.f32.mrf.mxu0 }
 0x6a8   :  { %v1185_v46 = vpop.f32.mrf.mxu0 }
 0x6a9   :  { %v1186_v47 = vadd.f32 %v1185_v46, %v1115_v45 }
 0x6aa   :  { %v2814_v49 = vpop.f32.mrf.mxu0 }
 0x6ab   :  { %v1196_v29 = vadd.f32 %v3350_v48, %v1186_v47  ;;  %v1308_v51 = vpop.f32.mrf.mxu1 }
 0x6ac   :  { %v1309_v55 = vadd.f32 %v1308_v51, %v1237_v42 }
 0x6ad   :  { %2988 = vtanh.f32 %v1196_v29  ;;  %v2819_v52 = vpop.f32.mrf.mxu1 }
 0x6ae   :  { %v1385_v57 = vmul.f32 %v2987_v40, %v1309_v55 }
 0x6af   :  { %v1381_v58 = vpop.f32.mrf.mxu1 }
 0x6b0   :  { %v1382_v59 = vadd.f32 %v1381_v58, %v1238_v43  ;;  %2828 = vmatmul.mubr.msk.f32.vlgmr.msra.gmra.mxu1 %vm34_vm0, %v1385_v57 }
 0x6b1   :  { %2831 = vmatpush3.msra.mxu1 %v2537_v44  ;;  %2832 = vmatprep.mubr.msk.f32.mxu1 %vm3043_vm1, %v3042_v4  ;;  %v2824_v60 = vpop.f32.mrf.mxu1 }
 0x6b2   :  { %v1386_v62 = vmul.f32 %v2985_v37, %v1382_v59  ;;  %2835 = vmatprep.subr.mxu1 %v3042_v4 }
 0x6b4   :  { %2833 = vmatmul.mubr.msk.f32.vlgmr.msra.gmra.mxu1 %vm34_vm0, %v1386_v62 }
 0x6b5   :  { %2836 = vmatpush3.msra.mxu1 %v3165_v53  ;;  %2843 = vmatprep.mubr.msk.f32.mxu1 %vm3043_vm1, %v3042_v4  ;;  %v2543_v53 = vld [vmem:[%s3740_s0 + $0x30] sm:$0xff] }
 0x6b6   :  { %2837 = vmatprep.subr.mxu1 %v3042_v4  ;;  %v1819_v1 = vsel %vm34_vm0, %v2543_v53, 0.0 }
 0x6b7   :  { %2838 = vmatpush3.msra.mxu1 %v3170_v54  ;;  %v2530_v54 = vmul.f32 -1.442695, %v1196_v29 }
 0x6b8   :  { %2839 = vmatprep.subr.mxu1 %v3042_v4 }
 0x6b9   :  { %2840 = vmatpush3.msra.mxu1 %v3178_v56  ;;  %2990 = vpow2.f32 %v2530_v54 }
 0x6ba   :  { %v2989_v63 = vpop.eup %2988  ;;  %2841 = vmatprep.subr.mxu1 %v3042_v4 }
 0x6bb   :  { %1206 = vrot.lane.b32.xlu1 %v2989_v63, %s3047_s30  ;;  %2842 = vmatpush3.msra.mxu1 %v3188_v61 }
 0x6bc   :  { %2846 = vmatprep.subr.mxu1 %v3042_v4 }
 0x6c6   :  { %v2991_v3 = vpop.eup %2990 }
 0x6c7   :  { %v1200_v56 = vadd.f32 1.0, %v2991_v3 }
 0x6c9   :  { %2992 = vrcp.f32 %v1200_v56 }
 0x6d6   :  { %v2993_v7 = vpop.eup %2992 }
 0x6d7   :  { %v1204_v40 = vmul.f32 %v2993_v7, %v3380_v50 }
 0x6df   :  { %1820 = vadd.xlane.f32.xlu1 %v1819_v1 }
 0x72d   :  { %v1207_v8 = vpop.permute.xlu1 %1206 }
 0x72e   :  { %v1209_v16 = vmul.f32 %v2993_v7, %v1207_v8 }
 0x730   :  { %1211 = vrot.lane.b32.xlu0 %v1209_v16, %s3044_s19 }
 0x768   :  { %v1821_v61 = vpop.xlane.xlu1 %1820 }
 0x769   :  { %v1825_v17 = vadd.f32 1.0, %v1821_v61 }
 0x76b   :  { %2994 = vrsqrt.f32 %v1825_v17 }
 0x770   :  { %v1458_v18 = vpop.f32.mrf.mxu1 }
 0x771   :  { %1535 = vst.msk [vmem:[#allocation2] sm:$0xff] %vm342_vm2, %v1458_v18 }
 0x772   :  { %v2829_v19 = vpop.f32.mrf.mxu1 }
 0x774   :  { %v1531_v22 = vpop.f32.mrf.mxu1 }
 0x775   :  { %1536 = vst.msk [vmem:[#allocation2 + $0x8] sm:$0xff] %vm342_vm2, %v1531_v22 }
 0x776   :  { %v2834_v2 = vpop.f32.mrf.mxu1 }
 0x778   :  { %v3494_v28 = vpop.eup %2994  ;;  %v1595_v34 = vld [vmem:[#allocation2 + $0x6] sm:$0x1]  ;;  %v1537_v38 = vld [vmem:[#allocation2] sm:$0x1]  ;;  %v1545_v46 = vld [vmem:[#allocation2 + $0x1] sm:$0x1] }
 0x779   :  { %v3497_v31 = vmul.f32 %v3494_v28, %v2545_v23  ;;  %v1555_v51 = vld [vmem:[#allocation2 + $0x2] sm:$0x1]  ;;  %v1565_v57 = vld [vmem:[#allocation2 + $0x3] sm:$0x1]  ;;  %v1575_v62 = vld [vmem:[#allocation2 + $0x4] sm:$0x1] }
 0x77a   :  { %v1585_v1 = vld [vmem:[#allocation2 + $0x5] sm:$0x1] }
 0x77b   :  { %2882 = vmatpush3.msra.mxu0 %v3497_v31 }
 0x77c   :  { %v1596_v32 = vld [vmem:[#allocation2 + $0xe] sm:$0x1]  ;;  %2884 = vmatmul.mubr.msk.f32.vlgmr.msra.gmra.mxu0 %vm34_vm0, %v2543_v53  ;;  %2886 = vmatprep.subr.mxu0 %v3042_v4  ;;  %v1538_v36 = vld [vmem:[#allocation2 + $0x8] sm:$0x1]  ;;  %v1546_v43 = vld [vmem:[#allocation2 + $0x9] sm:$0x1] }
 0x77d   :  { %v1599_v33 = vrot.slane %v1596_v32, 7  ;;  %2888 = vmatprep.mubr.msk.f32.mxu0 %vm3043_vm1, %v3042_v4  ;;  %v1541_v37 = vrot.slane %v1538_v36, 7  ;;  %v1549_v45 = vrot.slane %v1546_v43, 7  ;;  %v1556_v30 = vld [vmem:[#allocation2 + $0xa] sm:$0x1] }
 0x77e   :  { %v1559_v49 = vrot.slane %v1556_v30, 7  ;;  %v1566_v29 = vld [vmem:[#allocation2 + $0xb] sm:$0x1]  ;;  %v1576_v52 = vld [vmem:[#allocation2 + $0xc] sm:$0x1] }
 0x77f   :  { %v1600_v35 = vsel %vm350_vm3, %v1599_v33, %v1595_v34  ;;  %v1542_v39 = vsel %vm350_vm3, %v1541_v37, %v1537_v38  ;;  %v1550_v47 = vsel %vm350_vm3, %v1549_v45, %v1545_v46  ;;  %v1569_v55 = vrot.slane %v1566_v29, 7  ;;  %v1586_v60 = vld [vmem:[#allocation2 + $0xd] sm:$0x1]  ;;  %v1606_v2 = vld [vmem:[#allocation2 + $0xf] sm:$0x1] }
 0x780   :  { %1601 = vrot.lane.b32.xlu1 %v1600_v35, %s3049_s18  ;;  %1544 = vst.msk [vmem:[#allocation3] sm:$0x3] %vm353_vm4, %v1542_v39  ;;  %v1560_v50 = vsel %vm350_vm3, %v1559_v49, %v1555_v51  ;;  %v1579_v59 = vrot.slane %v1576_v52, 7  ;;  %v1589_v53 = vrot.slane %v1586_v60, 7  ;;  %v1609_v23 = vrot.slane %v1606_v2, 7 }
 0x781   :  { %v1570_v58 = vsel %vm350_vm3, %v1569_v55, %v1565_v57  ;;  %v1605_v32 = vld [vmem:[#allocation2 + $0x7] sm:$0x1] }
 0x782   :  { %v1580_v63 = vsel %vm350_vm3, %v1579_v59, %v1575_v62  ;;  %v1590_v54 = vsel %vm350_vm3, %v1589_v53, %v1585_v1  ;;  %v1610_v33 = vsel %vm350_vm3, %v1609_v23, %v1605_v32 }
 0x7a2   :  { %v1212_v41 = vpop.permute.xlu0 %1211 }
 0x7a3   :  { %v3509_v42 = vadd.f32 %v1212_v41, %v1204_v40 }
 0x7a5   :  { %2996 = vtanh.f32 %v3509_v42 }
 0x7b2   :  { %v2997_v44 = vpop.eup %2996 }
 0x7b3   :  { %1217 = vrot.lane.b32.xlu0 %v2997_v44, %s3047_s30 }
 0x7b7   :  { %1551 = vrot.lane.b32.xlu0 %v1550_v47, %s3045_s20 }
 0x7bb   :  { %1561 = vrot.lane.b32.xlu0 %v1560_v50, %s3044_s19 }
 0x7bf   :  { %1571 = vrot.lane.b32.xlu0 %v1570_v58, %s3046_s25 }
 0x7c3   :  { %1581 = vrot.lane.b32.xlu0 %v1580_v63, %s3047_s30 }
 0x7c7   :  { %1591 = vrot.lane.b32.xlu0 %v1590_v54, %s3048_s13 }
 0x7f2   :  { %v1602_v19 = vpop.permute.xlu1 %1601 }
 0x825   :  { %v1218_v3 = vpop.permute.xlu0 %1217 }
 0x826   :  { %v1220_v56 = vmul.f32 %v2993_v7, %v1218_v3  ;;  %v2544_v7 = vld [vmem:[%s3740_s0 + $0x38] sm:$0xff] }
 0x827   :  { %v1822_v22 = vsel %vm34_vm0, %v2544_v7, 0.0 }
 0x828   :  { %1637 = vrot.lane.b32.xlu0 %v1220_v56, %s3044_s19 }
 0x829   :  { %v1552_v8 = vpop.permute.xlu0 %1551 }
 0x82a   :  { %1554 = vst.msk [vmem:[#allocation3] sm:$0x3] %vm364_vm5, %v1552_v8 }
 0x82d   :  { %v1562_v16 = vpop.permute.xlu0 %1561 }
 0x82e   :  { %1564 = vst.msk [vmem:[#allocation3] sm:$0x3] %vm375_vm6, %v1562_v16 }
 0x831   :  { %v1572_v61 = vpop.permute.xlu0 %1571 }
 0x832   :  { %1574 = vst.msk [vmem:[#allocation3] sm:$0x3] %vm386_vm7, %v1572_v61 }
 0x835   :  { %v1582_v17 = vpop.permute.xlu0 %1581 }
 0x836   :  { %1584 = vst.msk [vmem:[#allocation3] sm:$0x3] %vm397_vm8, %v1582_v17 }
 0x839   :  { %v1592_v18 = vpop.permute.xlu0 %1591 }
 0x83a   :  { %1594 = vst.msk [vmem:[#allocation3] sm:$0x3] %vm408_vm9, %v1592_v18  ;;  %v2227_v18 = vld [vmem:[%s3744_s4 + $0x18] sm:$0xff] }
 0x83b   :  { %1604 = vst.msk [vmem:[#allocation3] sm:$0x3] %vm419_vm10, %v1602_v19  ;;  %v2226_v19 = vld [vmem:[%s3744_s4 + $0x10] sm:$0xff] }
 0x83c   :  { %v1900_v34 = vpop.f32.mrf.mxu0 }
 0x83e   :  { %v2885_v35 = vpop.f32.mrf.mxu0 }
 0x847   :  { %1823 = vadd.xlane.f32.xlu0 %v1822_v22 }
 0x85d   :  { %1611 = vrot.lane.b32.xlu0 %v1610_v33, %s3050_s23 }
 0x89a   :  { %v1638_v36 = vpop.permute.xlu0 %1637 }
 0x89b   :  { %2844 = vmatmul.mubr.msk.f32.vlgmr.msra.gmra.mxu1 %vm453_vm12, %v1638_v36 }
 0x89c   :  { %2847 = vmatpush3.msra.mxu1 %v3196_v0  ;;  %2878 = vmatprep.mubr.msk.f32.mxu1 %vm3043_vm1, %v3042_v4 }
 0x89d   :  { %2848 = vmatprep.subr.mxu1 %v3042_v4 }
 0x89e   :  { %2849 = vmatpush3.msra.mxu1 %v3205_v5 }
 0x89f   :  { %2850 = vmatprep.subr.mxu1 %v3042_v4 }
 0x8a0   :  { %2851 = vmatpush3.msra.mxu1 %v3213_v6 }
 0x8a1   :  { %2852 = vmatprep.subr.mxu1 %v3042_v4 }
 0x8a2   :  { %2853 = vmatpush3.msra.mxu1 %v3223_v9 }
 0x8a3   :  { %2854 = vmatprep.subr.mxu1 %v3042_v4 }
 0x8a4   :  { %2855 = vmatpush3.msra.mxu1 %v3231_v10  ;;  %v2546_v10 = vld [vmem:[%s3741_s1 + $0x38] sm:$0xff] }
 0x8a5   :  { %2856 = vmatprep.subr.mxu1 %v3042_v4 }
 0x8a6   :  { %2857 = vmatpush3.msra.mxu1 %v3238_v11 }
 0x8a7   :  { %2858 = vmatprep.subr.mxu1 %v3042_v4 }
 0x8a8   :  { %2859 = vmatpush3.msra.mxu1 %v3245_v12 }
 0x8a9   :  { %2860 = vmatprep.subr.mxu1 %v3042_v4 }
 0x8aa   :  { %2861 = vmatpush3.msra.mxu1 %v3252_v13  ;;  %v1901_v13 = vadd.f32 %v1900_v34, %v3497_v31 }
 0x8ab   :  { %2862 = vmatprep.subr.mxu1 %v3042_v4 }
 0x8ac   :  { %2863 = vmatpush3.msra.mxu1 %v3259_v14  ;;  %v2549_v14 = vld [vmem:[%s3742_s2 + $0x18] sm:$0xff] }
 0x8ad   :  { %2864 = vmatprep.subr.mxu1 %v3042_v4 }
 0x8ae   :  { %2865 = vmatpush3.msra.mxu1 %v3266_v15  ;;  %v1977_v15 = vmul.f32 %v3494_v28, %v1901_v13 }
 0x8af   :  { %2866 = vmatprep.subr.mxu1 %v3042_v4 }
 0x8b0   :  { %2867 = vmatpush3.msra.mxu1 %v3279_v20 }
 0x8b1   :  { %2868 = vmatprep.subr.mxu1 %v3042_v4 }
 0x8b2   :  { %2869 = vmatpush3.msra.mxu1 %v3284_v21 }
 0x8b3   :  { %2870 = vmatprep.subr.mxu1 %v3042_v4 }
 0x8b4   :  { %2871 = vmatpush3.msra.mxu1 %v3295_v24 }
 0x8b5   :  { %2872 = vmatprep.subr.mxu1 %v3042_v4 }
 0x8b6   :  { %2873 = vmatpush3.msra.mxu1 %v3302_v25 }
 0x8b7   :  { %2874 = vmatprep.subr.mxu1 %v3042_v4 }
 0x8b8   :  { %2875 = vmatpush3.msra.mxu1 %v3309_v26 }
 0x8b9   :  { %2876 = vmatprep.subr.mxu1 %v3042_v4 }
 0x8ba   :  { %2877 = vmatpush3.msra.mxu1 %v3314_v27 }
 0x8bb   :  { %2947 = vmatprep.subr.mxu1 %v3042_v4 }
 0x8d0   :  { %v1824_v0 = vpop.xlane.xlu0 %1823 }
 0x8d1   :  { %v1826_v5 = vadd.f32 1.0, %v1824_v0 }
 0x8d3   :  { %2998 = vrsqrt.f32 %v1826_v5 }
 0x8d4   :  { %v1612_v6 = vpop.permute.xlu0 %1611 }
 0x8d5   :  { %1614 = vst.msk [vmem:[#allocation3] sm:$0x3] %vm430_vm11, %v1612_v6 }
 0x8dc   :  { %v1615_v9 = vld [vmem:[#allocation3] sm:$0x3] }
 0x8dd   :  { %2879 = vmatmul.mubr.f32.vlgmr.msra.gmra.mxu1 %v1615_v9 }
 0x8de   :  { %2955 = vmatprep.mubr.msk.f32.mxu1 %vm3043_vm1, %v3042_v4 }
 0x8e0   :  { %v2999_v11 = vpop.eup %2998 }
 0x8e1   :  { %v1830_v12 = vmul.f32 %v2999_v11, %v2546_v10 }
 0x8e3   :  { %2887 = vmatpush3.msra.mxu0 %v1830_v12 }
 0x8e4   :  { %2889 = vmatmul.mubr.msk.f32.vlgmr.msra.gmra.mxu0 %vm34_vm0, %v2544_v7  ;;  %2891 = vmatprep.subr.mxu0 %v3042_v4  ;;  %v2224_v7 = vld [vmem:[%s3744_s4] sm:$0xff] }
 0x8e5   :  { %2892 = vmatpush3.msra.mxu0 %v2549_v14  ;;  %2893 = vmatprep.mubr.msk.f32.mxu0 %vm3043_vm1, %v3042_v4 }
 0x8e6   :  { %2896 = vmatprep.subr.mxu0 %v3042_v4 }
 0x8e8   :  { %2894 = vmatmul.mubr.msk.f32.vlgmr.msra.gmra.mxu0 %vm34_vm0, %v1977_v15 }
 0x8e9   :  { %2897 = vmatpush3.msra.mxu0 %v2549_v14  ;;  %2898 = vmatprep.mubr.msk.f32.mxu0 %vm3043_vm1, %v3042_v4 }
 0x8ea   :  { %2901 = vmatprep.subr.mxu0 %v3042_v4 }
 0x95b   :  { %v1707_v20 = vpop.f32.mrf.mxu1 }
 0x95d   :  { %v2845_v21 = vpop.f32.mrf.mxu1 }
 0x99d   :  { %v1777_v24 = vpop.f32.mrf.mxu1 }
 0x99e   :  { %v1778_v25 = vadd.f32 %v1777_v24, %v1707_v20  ;;  %v2223_v20 = vld [vmem:[%s3743_s3 + $0x78] sm:$0xff] }
 0x99f   :  { %v2880_v26 = vpop.f32.mrf.mxu1 }
 0x9a0   :  { %v1788_v27 = vadd.f32 %v3350_v48, %v1778_v25  ;;  %v2222_v25 = vld [vmem:[%s3743_s3 + $0x70] sm:$0xff]  ;;  %v2221_v26 = vld [vmem:[%s3743_s3 + $0x68] sm:$0xff] }
 0x9a2   :  { %3000 = vtanh.f32 %v1788_v27  ;;  %v2542_v43 = vmul.f32 -1.442695, %v1788_v27 }
 0x9a4   :  { %v1973_v31 = vpop.f32.mrf.mxu0  ;;  %3002 = vpow2.f32 %v2542_v43 }
 0x9a5   :  { %v1974_v28 = vadd.f32 %v1973_v31, %v1830_v12  ;;  %v2220_v31 = vld [vmem:[%s3743_s3 + $0x60] sm:$0xff] }
 0x9a6   :  { %v2890_v37 = vpop.f32.mrf.mxu0 }
 0x9a7   :  { %v1978_v38 = vmul.f32 %v2999_v11, %v1974_v28  ;;  %v2219_v37 = vld [vmem:[%s3743_s3 + $0x58] sm:$0xff] }
 0x9a8   :  { %v2050_v39 = vpop.f32.mrf.mxu0 }
 0x9a9   :  { %2127 = vst.msk [vmem:[#allocation2] sm:$0xff] %vm342_vm2, %v2050_v39  ;;  %2899 = vmatmul.mubr.msk.f32.vlgmr.msra.gmra.mxu0 %vm34_vm0, %v1978_v38  ;;  %v2218_v39 = vld [vmem:[%s3743_s3 + $0x50] sm:$0xff] }
 0x9aa   :  { %v2895_v40 = vpop.f32.mrf.mxu0  ;;  %2909 = vmatprep.mubr.msk.f32.mxu0 %vm3043_vm1, %v3042_v4  ;;  %2902 = vmatpush3.msra.mxu0 %v2227_v18 }
 0x9ab   :  { %2903 = vmatprep.subr.mxu0 %v3042_v4  ;;  %v2217_v40 = vld [vmem:[%s3743_s3 + $0x48] sm:$0xff] }
 0x9ac   :  { %2904 = vmatpush3.msra.mxu0 %v2226_v19 }
 0x9ad   :  { %2905 = vmatprep.subr.mxu0 %v3042_v4 }
 0x9af   :  { %v3001_v41 = vpop.eup %3000 }
 0x9b0   :  { %1798 = vrot.lane.b32.xlu1 %v3001_v41, %s3047_s30  ;;  %v2147_v55 = vld [vmem:[#allocation2 + $0x2] sm:$0x1]  ;;  %v2129_v62 = vld [vmem:[#allocation2] sm:$0x1]  ;;  %v2167_v63 = vld [vmem:[#allocation2 + $0x4] sm:$0x1] }
 0x9b1   :  { %v3003_v48 = vpop.eup %3002  ;;  %v2187_v3 = vld [vmem:[#allocation2 + $0x6] sm:$0x1]  ;;  %v2137_v34 = vld [vmem:[#allocation2 + $0x1] sm:$0x1]  ;;  %v2157_v5 = vld [vmem:[#allocation2 + $0x3] sm:$0x1] }
 0x9b2   :  { %v1792_v44 = vadd.f32 1.0, %v3003_v48  ;;  %v2177_v11 = vld [vmem:[#allocation2 + $0x5] sm:$0x1]  ;;  %v2197_v14 = vld [vmem:[#allocation2 + $0x7] sm:$0x1] }
 0x9b3   :  { %v2216_v48 = vld [vmem:[%s3743_s3 + $0x40] sm:$0xff] }
 0x9b4   :  { %3004 = vrcp.f32 %v1792_v44  ;;  %v2215_v44 = vld [vmem:[%s3743_s3 + $0x38] sm:$0xff] }
 0x9c1   :  { %v3005_v45 = vpop.eup %3004 }
 0x9c2   :  { %v1796_v8 = vmul.f32 %v3005_v45, %v3509_v42  ;;  %v2225_v42 = vld [vmem:[%s3744_s4 + $0x8] sm:$0xff] }
 0x9c3   :  { %2906 = vmatpush3.msra.mxu0 %v2225_v42  ;;  %v2408_v42 = vld [vmem:[%s3746_s6 + $0x18] sm:$0xff] }
 0x9c4   :  { %2907 = vmatprep.subr.mxu0 %v3042_v4  ;;  %2948 = vmatpush3.msra.mxu1 %v2408_v42 }
 0x9c5   :  { %2908 = vmatpush3.msra.mxu0 %v2224_v7  ;;  %v2407_v7 = vld [vmem:[%s3746_s6 + $0x10] sm:$0xff]  ;;  %2949 = vmatprep.subr.mxu1 %v3042_v4 }
 0x9c6   :  { %2912 = vmatprep.subr.mxu0 %v3042_v4  ;;  %2950 = vmatpush3.msra.mxu1 %v2407_v7 }
 0x9c7   :  { %2951 = vmatprep.subr.mxu1 %v3042_v4 }
 0xa22   :  { %v1799_v30 = vpop.permute.xlu1 %1798 }
 0xa23   :  { %v1801_v46 = vmul.f32 %v3005_v45, %v1799_v30  ;;  %v2214_v30 = vld [vmem:[%s3743_s3 + $0x30] sm:$0xff] }
 0xa25   :  { %1803 = vrot.lane.b32.xlu1 %v1801_v46, %s3044_s19  ;;  %v2213_v46 = vld [vmem:[%s3743_s3 + $0x28] sm:$0xff] }
 0xa69   :  { %v2123_v47 = vpop.f32.mrf.mxu0 }
 0xa6a   :  { %2128 = vst.msk [vmem:[#allocation2 + $0x8] sm:$0xff] %vm342_vm2, %v2123_v47  ;;  %v2212_v47 = vld [vmem:[%s3743_s3 + $0x20] sm:$0xff] }
 0xa6b   :  { %v2900_v49 = vpop.f32.mrf.mxu0 }
 0xa6c   :  { %v2211_v49 = vld [vmem:[%s3743_s3 + $0x18] sm:$0xff] }
 0xa71   :  { %v2148_v29 = vld [vmem:[#allocation2 + $0xa] sm:$0x1]  ;;  %v2168_v51 = vld [vmem:[#allocation2 + $0xc] sm:$0x1]  ;;  %v2130_v58 = vld [vmem:[#allocation2 + $0x8] sm:$0x1] }
 0xa72   :  { %v2151_v50 = vrot.slane %v2148_v29, 7  ;;  %v2171_v57 = vrot.slane %v2168_v51, 7  ;;  %v2188_v59 = vld [vmem:[#allocation2 + $0xe] sm:$0x1]  ;;  %v2133_v60 = vrot.slane %v2130_v58, 7  ;;  %v2210_v29 = vld [vmem:[%s3743_s3 + $0x10] sm:$0xff] }
 0xa73   :  { %v2191_v54 = vrot.slane %v2188_v59, 7  ;;  %v2138_v22 = vld [vmem:[#allocation2 + $0x9] sm:$0x1]  ;;  %v2158_v33 = vld [vmem:[#allocation2 + $0xb] sm:$0x1] }
 0xa74   :  { %v2152_v52 = vsel %vm350_vm3, %v2151_v50, %v2147_v55  ;;  %v2134_v53 = vsel %vm350_vm3, %v2133_v60, %v2129_v62  ;;  %v2172_v1 = vsel %vm350_vm3, %v2171_v57, %v2167_v63  ;;  %v2141_v32 = vrot.slane %v2138_v22, 7  ;;  %v2178_v0 = vld [vmem:[#allocation2 + $0xd] sm:$0x1]  ;;  %v2198_v10 = vld [vmem:[#allocation2 + $0xf] sm:$0x1]  ;;  %v2208_v50 = vld [vmem:[%s3743_s3] sm:$0xff] }
 0xa75   :  { %2153 = vrot.lane.b32.xlu0 %v2152_v52, %s3044_s19  ;;  %2136 = vst.msk [vmem:[#allocation3] sm:$0x3] %vm353_vm4, %v2134_v53  ;;  %v2192_v56 = vsel %vm350_vm3, %v2191_v54, %v2187_v3  ;;  %v2161_v36 = vrot.slane %v2158_v33, 7  ;;  %v2181_v9 = vrot.slane %v2178_v0, 7  ;;  %v2201_v13 = vrot.slane %v2198_v10, 7  ;;  %v2209_v51 = vld [vmem:[%s3743_s3 + $0x8] sm:$0xff] }
 0xa76   :  { %v2142_v35 = vsel %vm350_vm3, %v2141_v32, %v2137_v34  ;;  %v2553_v59 = vld [vmem:[%s3745_s5] ss:$0 sm:$0xff]  ;;  %v2406_v22 = vld [vmem:[%s3746_s6 + $0x8] sm:$0xff] }
 0xa77   :  { %v2162_v6 = vsel %vm350_vm3, %v2161_v36, %v2157_v5  ;;  %v2182_v12 = vsel %vm350_vm3, %v2181_v9, %v2177_v11  ;;  %v2202_v15 = vsel %vm350_vm3, %v2201_v13, %v2197_v14  ;;  %2952 = vmatpush3.msra.mxu1 %v2406_v22  ;;  %v2555_v34 = vld [vmem:[%s3747_s7] ss:$0 sm:$0xff] }
 0xa78   :  { %2953 = vmatprep.subr.mxu1 %v3042_v4 }
 0xa79   :  { %2173 = vrot.lane.b32.xlu0 %v2172_v1, %s3047_s30 }
 0xa7d   :  { %2193 = vrot.lane.b32.xlu0 %v2192_v56, %s3049_s18 }
 0xa97   :  { %v1804_v16 = vpop.permute.xlu1 %1803 }
 0xa98   :  { %v3608_v61 = vadd.f32 %v1804_v16, %v1796_v8 }
 0xa9a   :  { %3006 = vtanh.f32 %v3608_v61 }
 0xaa7   :  { %v3007_v17 = vpop.eup %3006 }
 0xaa8   :  { %1809 = vrot.lane.b32.xlu1 %v3007_v17, %s3047_s30 }
 0xae7   :  { %v2154_v24 = vpop.permute.xlu0 %2153 }
 0xaeb   :  { %v2174_v28 = vpop.permute.xlu0 %2173 }
 0xaef   :  { %v2194_v43 = vpop.permute.xlu0 %2193 }
 0xb1a   :  { %v1810_v2 = vpop.permute.xlu1 %1809 }
 0xb1b   :  { %v1812_v23 = vmul.f32 %v3005_v45, %v1810_v2 }
 0xb1d   :  { %2229 = vrot.lane.b32.xlu1 %v1812_v23, %s3044_s19 }
 0xb21   :  { %2143 = vrot.lane.b32.xlu1 %v2142_v35, %s3045_s20 }
 0xb25   :  { %2163 = vrot.lane.b32.xlu1 %v2162_v6, %s3046_s25 }
 0xb29   :  { %2183 = vrot.lane.b32.xlu1 %v2182_v12, %s3048_s13 }
 0xb2d   :  { %2203 = vrot.lane.b32.xlu1 %v2202_v15, %s3050_s23 }
 0xb8f   :  { %v2230_v21 = vpop.permute.xlu1 %2229 }
 0xb90   :  { %2910 = vmatmul.mubr.msk.f32.vlgmr.msra.gmra.mxu0 %vm453_vm12, %v2230_v21 }
 0xb91   :  { %2913 = vmatpush3.msra.mxu0 %v2223_v20  ;;  %2944 = vmatprep.mubr.msk.f32.mxu0 %vm3043_vm1, %v3042_v4 }
 0xb92   :  { %2914 = vmatprep.subr.mxu0 %v3042_v4 }
 0xb93   :  { %2915 = vmatpush3.msra.mxu0 %v2222_v25  ;;  %v2144_v27 = vpop.permute.xlu1 %2143 }
 0xb94   :  { %2916 = vmatprep.subr.mxu0 %v3042_v4  ;;  %2146 = vst.msk [vmem:[#allocation3] sm:$0x3] %vm364_vm5, %v2144_v27 }
 0xb95   :  { %2156 = vst.msk [vmem:[#allocation3] sm:$0x3] %vm375_vm6, %v2154_v24  ;;  %2917 = vmatpush3.msra.mxu0 %v2221_v26 }
 0xb96   :  { %2918 = vmatprep.subr.mxu0 %v3042_v4 }
 0xb97   :  { %2919 = vmatpush3.msra.mxu0 %v2220_v31  ;;  %v2164_v38 = vpop.permute.xlu1 %2163 }
 0xb98   :  { %2920 = vmatprep.subr.mxu0 %v3042_v4  ;;  %2166 = vst.msk [vmem:[#allocation3] sm:$0x3] %vm386_vm7, %v2164_v38 }
 0xb99   :  { %2176 = vst.msk [vmem:[#allocation3] sm:$0x3] %vm397_vm8, %v2174_v28  ;;  %2921 = vmatpush3.msra.mxu0 %v2219_v37 }
 0xb9a   :  { %2922 = vmatprep.subr.mxu0 %v3042_v4 }
 0xb9b   :  { %2923 = vmatpush3.msra.mxu0 %v2218_v39  ;;  %v2184_v41 = vpop.permute.xlu1 %2183 }
 0xb9c   :  { %2924 = vmatprep.subr.mxu0 %v3042_v4  ;;  %2186 = vst.msk [vmem:[#allocation3] sm:$0x3] %vm408_vm9, %v2184_v41 }
 0xb9d   :  { %2196 = vst.msk [vmem:[#allocation3] sm:$0x3] %vm419_vm10, %v2194_v43  ;;  %2925 = vmatpush3.msra.mxu0 %v2217_v40 }
 0xb9e   :  { %2926 = vmatprep.subr.mxu0 %v3042_v4 }
 0xb9f   :  { %2927 = vmatpush3.msra.mxu0 %v2216_v48  ;;  %v2204_v45 = vpop.permute.xlu1 %2203 }
 0xba0   :  { %2928 = vmatprep.subr.mxu0 %v3042_v4  ;;  %2206 = vst.msk [vmem:[#allocation3] sm:$0x3] %vm430_vm11, %v2204_v45 }
 0xba1   :  { %2929 = vmatpush3.msra.mxu0 %v2215_v44 }
 0xba2   :  { %2930 = vmatprep.subr.mxu0 %v3042_v4 }
 0xba3   :  { %2931 = vmatpush3.msra.mxu0 %v2214_v30 }
 0xba4   :  { %2932 = vmatprep.subr.mxu0 %v3042_v4 }
 0xba5   :  { %2933 = vmatpush3.msra.mxu0 %v2213_v46 }
 0xba6   :  { %2934 = vmatprep.subr.mxu0 %v3042_v4 }
 0xba7   :  { %2935 = vmatpush3.msra.mxu0 %v2212_v47  ;;  %v2207_v55 = vld [vmem:[#allocation3] sm:$0x3] }
 0xba8   :  { %2936 = vmatprep.subr.mxu0 %v3042_v4 }
 0xba9   :  { %2937 = vmatpush3.msra.mxu0 %v2211_v49 }
 0xbaa   :  { %2938 = vmatprep.subr.mxu0 %v3042_v4 }
 0xbab   :  { %2939 = vmatpush3.msra.mxu0 %v2210_v29 }
 0xbac   :  { %2940 = vmatprep.subr.mxu0 %v3042_v4 }
 0xbad   :  { %2941 = vmatpush3.msra.mxu0 %v2209_v51 }
 0xbae   :  { %2942 = vmatprep.subr.mxu0 %v3042_v4 }
 0xbaf   :  { %2943 = vmatpush3.msra.mxu0 %v2208_v50 }
 0xbb0   :  { %2945 = vmatmul.mubr.f32.vlgmr.msra.gmra.mxu0 %v2207_v55 }
 0xc50   :  { %v2299_v52 = vpop.f32.mrf.mxu0 }
 0xc52   :  { %v2911_v57 = vpop.f32.mrf.mxu0 }
 0xc70   :  { %v2369_v58 = vpop.f32.mrf.mxu0 }
 0xc71   :  { %v2370_v60 = vadd.f32 %v2369_v58, %v2299_v52 }
 0xc72   :  { %v2946_v62 = vpop.f32.mrf.mxu0 }
 0xc73   :  { %v2380_v63 = vadd.f32 %v2553_v59, %v2370_v60 }
 0xc75   :  { %3008 = vtanh.f32 %v2380_v63  ;;  %v2554_v1 = vmul.f32 -1.442695, %v2380_v63 }
 0xc77   :  { %3010 = vpow2.f32 %v2554_v1 }
 0xc82   :  { %v3009_v53 = vpop.eup %3008 }
 0xc83   :  { %2390 = vrot.lane.b32.xlu0 %v3009_v53, %s3047_s30 }
 0xc84   :  { %v3011_v54 = vpop.eup %3010 }
 0xc85   :  { %v2384_v3 = vadd.f32 1.0, %v3011_v54 }
 0xc87   :  { %3012 = vrcp.f32 %v2384_v3 }
 0xc94   :  { %v3013_v56 = vpop.eup %3012 }
 0xc95   :  { %v2388_v17 = vmul.f32 %v3013_v56, %v3608_v61  ;;  %v2405_v61 = vld [vmem:[%s3746_s6] sm:$0xff]  ;;  %s3051_s6 = smov [#allocation4]  }
 0xc96   :  { %2954 = vmatpush3.msra.mxu1 %v2405_v61 }
 0xcf5   :  { %v2391_v8 = vpop.permute.xlu0 %2390 }
 0xcf6   :  { %v2393_v16 = vmul.f32 %v3013_v56, %v2391_v8 }
 0xcf8   :  { %2395 = vrot.lane.b32.xlu1 %v2393_v16, %s3044_s19 }
 0xd6a   :  { %v2396_v18 = vpop.permute.xlu1 %2395 }
 0xd6b   :  { %v2398_v19 = vadd.f32 %v2396_v18, %v2388_v17 }
 0xd6d   :  { %3014 = vtanh.f32 %v2398_v19 }
 0xd7a   :  { %v3015_v2 = vpop.eup %3014 }
 0xd7b   :  { %2401 = vrot.lane.b32.xlu0 %v3015_v2, %s3047_s30  ;;  %s2505_s30 = sshll.u32 %s3051_s6, 4  ;;  %s2506_s30 = int_to_ptr.vmem [resolvable:$true] %s2505_s30 }
 0xd7c   :  { %p3025_p1 = scmp.lt.s32.totalorder %s2506_s30, %s2506_s30 }
 0xded   :  { %v2402_v23 = vpop.permute.xlu0 %2401 }
 0xdee   :  { %v2404_v32 = vmul.f32 %v3013_v56, %v2402_v23 }
 0xdf0   :  { %2417 = vrot.lane.b32.xlu1 %v2404_v32, %s3044_s19  ;;  %s3020_s19 = scalar_lea.vmem %s2506_s30, 32 }
 0xdf1   :  { %p3021_p0 = scmp.ne.s32.totalorder %s2506_s30, %s3020_s19  ;;  %p3026_p2 = scmp.lt.s32.totalorder %s3020_s19, %s3020_s19 }
 0xdf3   :  { %p3027_p3 = por %p3026_p2, %p3025_p1 }
 0xdf5   :  { %p3028_p4 = pnand %p3027_p3, %p3021_p0 }
 0xe62   :  { %v2418_v33 = vpop.permute.xlu1 %2417 }
 0xe63   :  { %2956 = vmatmul.mubr.msk.f32.vlgmr.msra.gmra.mxu1 %vm453_vm12, %v2418_v33 }
 0xf23   :  { %v2487_v35 = vpop.f32.mrf.mxu1 }
 0xf24   :  { %v2488_v36 = vadd.f32 %v2555_v34, %v2487_v35 }
 0xf25   :  { %v2957_v0 = vpop.f32.mrf.mxu1 }
 0xf26   :  { %v2557_v5 = vmul.f32 -1.442695, %v2488_v36 }
 0xf28   :  { %3016 = vpow2.f32 %v2557_v5 }
 0xf35   :  { %v3017_v4 = vpop.eup %3016 }
 0xf36   :  { %v2494_v6 = vadd.f32 1.0, %v3017_v4 }
 0xf38   :  { %3018 = vrcp.f32 %v2494_v6 }
 0xf45   :  { %v3019_v9 = vpop.eup %3018 }
 0xf46   :  { %2498 = vst.msk [vmem:[#allocation4] sm:$0x3] %vm2497_vm13, %v3019_v9 }
 0xf47   :  { %3031 = shalt.err (!%p3028_p4)
}
 0xf48   :  { %2508 = dma.vmem_to_hbm [thread:$0]  %s2506_s30, 32, %s3748_s8, [#allocation5]  }
 0xf49   :  { %3040 = dma.done.wait [#allocation5], 32  }
 0xf4a   :  { %3041 = vsyncadd [#allocation5], 4294967264 }
 0xf4b   :  { %2512 = vsyncpa [#allocation5], 1 }

</bundles_post_ra>
